<compile_context>
chip_gen: v5e
topology: v5e:2x2
jax: 0.10.0
libtpu: 0.0.40
codegen_flags: <defaults>
</compile_context>

<pallas_src>
import math
from functools import partial

import jax
import jax.numpy as jnp
from jax import lax
from jax.experimental import pallas as pl
from jax.experimental.pallas import tpu as pltpu

EPS = 1e-5                       # torch.nn.LayerNorm default
MATMUL_DTYPE = jnp.bfloat16      # MXU operand dtype (accumulation stays float32)
ROW_TILE = 256                   # rows of (B*T, E) per grid step
VMEM_LIMIT_BYTES = 48 * 1024 * 1024


def _cparams(n_grid_dims):
    return pltpu.CompilerParams(
        dimension_semantics=("parallel",) * n_grid_dims,
        vmem_limit_bytes=VMEM_LIMIT_BYTES,
    )


def _layernorm(x, g, b):
    mu = jnp.mean(x, axis=-1, keepdims=True)
    xc = x - mu
    var = jnp.mean(xc * xc, axis=-1, keepdims=True)   # biased variance (torch)
    return xc * lax.rsqrt(var + EPS) * g + b


# ---------------------------------------------------------------------------
# Pallas kernel bodies
# ---------------------------------------------------------------------------
def _linear_kernel(x_ref, w_ref, b_ref, o_ref, *, matmul_dtype):
    y = jnp.dot(x_ref[...].astype(matmul_dtype), w_ref[...],
                preferred_element_type=jnp.float32) + b_ref[...]
    o_ref[...] = y.astype(o_ref.dtype)


def _ln_qkv_kernel(x_ref, g_ref, b_ref, w_ref, bias_ref, o_ref, *, matmul_dtype):
    y = _layernorm(x_ref[...], g_ref[...], b_ref[...])          # (tm, E)
    o_ref[...] = (jnp.dot(y.astype(matmul_dtype), w_ref[...],
                          preferred_element_type=jnp.float32)
                  + bias_ref[...]).astype(o_ref.dtype)          # (tm, 3E)


def _proj_residual_kernel(a_ref, r_ref, w_ref, b_ref, o_ref, *, matmul_dtype):
    y = jnp.dot(a_ref[...].astype(matmul_dtype), w_ref[...],
                preferred_element_type=jnp.float32) + b_ref[...]
    o_ref[...] = (r_ref[...] + y).astype(o_ref.dtype)


def _ln_ffn_kernel(x_ref, g_ref, b_ref, w1_ref, b1_ref, w2_ref, b2_ref, o_ref,
                   *, matmul_dtype):
    x = x_ref[...]                                              # (tm, E)
    y = _layernorm(x, g_ref[...], b_ref[...])
    h = jnp.dot(y.astype(matmul_dtype), w1_ref[...],
                preferred_element_type=jnp.float32) + b1_ref[...]
    h = h * 0.5 * (1.0 + lax.erf(h * (1.0 / math.sqrt(2.0))))   # exact erf GELU
    o = jnp.dot(h.astype(matmul_dtype), w2_ref[...],
                preferred_element_type=jnp.float32) + b2_ref[...]
    o_ref[...] = (x + o).astype(o_ref.dtype)


def _attention_kernel(qkv_ref, cq_ref, sq_ref, ck_ref, sk_ref, o_ref, *,
                      num_heads, matmul_dtype):
    # One program == one batch element; all heads processed inside.
    t = qkv_ref.shape[1]
    e = qkv_ref.shape[2] // 3
    dh = e // num_heads
    half = dh // 2

    qkv = qkv_ref[0]                                            # (T, 3E)
    cq, sq = cq_ref[...], sq_ref[...]                           # q tables (scale folded in)
    ck, sk = ck_ref[...], sk_ref[...]                           # k tables
    # rotate_half sign is folded into the sin tables, so only a pure half-rotation
    # is needed here.  (pltpu.roll would move this to the XLU; the concat of static
    # slices is kept for guaranteed lowering at small head dims.)

    def rot(x):                                                 # (T, Dh) -> (T, Dh)
        return jnp.concatenate([x[:, half:], x[:, :half]], axis=-1)

    outs = []
    for h in range(num_heads):                                  # static unroll
        q = qkv[:, h * dh:(h + 1) * dh]
        k = qkv[:, e + h * dh: e + (h + 1) * dh]
        v = qkv[:, 2 * e + h * dh: 2 * e + (h + 1) * dh]
        qr = q * cq + rot(q) * sq                               # rotary (+scale) on q
        kr = k * ck + rot(k) * sk                               # rotary on k
        s = lax.dot_general(qr.astype(matmul_dtype), kr.astype(matmul_dtype),
                            (((1,), (1,)), ((), ())),
                            preferred_element_type=jnp.float32)  # (T, T) = q @ k^T
        s = s - jnp.max(s, axis=-1, keepdims=True)
        p = jnp.exp(s)
        inv = pl.reciprocal(jnp.sum(p, axis=-1, keepdims=True), approx=True)
        o = jnp.dot(p.astype(matmul_dtype), v.astype(matmul_dtype),
                    preferred_element_type=jnp.float32) * inv
        outs.append(o)
    o_ref[0] = jnp.concatenate(outs, axis=-1).astype(o_ref.dtype)   # lane-dense (T, E)


def _final_kernel(x_ref, g_ref, b_ref, w_ref, bias_ref, o_ref, *, matmul_dtype):
    # final LayerNorm + mean over sequence + output projection, one batch / program
    y = _layernorm(x_ref[0], g_ref[...], b_ref[...])            # (T, E)
    xm = jnp.mean(y, axis=0, keepdims=True)                     # (1, E)
    o_ref[0] = (jnp.dot(xm.astype(matmul_dtype), w_ref[...],
                        preferred_element_type=jnp.float32)
                + bias_ref[...]).astype(o_ref.dtype)


# ---------------------------------------------------------------------------
# pallas_call wrappers (row-tiled grids, weights resident via constant index_map)
# ---------------------------------------------------------------------------
def linear_rows(x2d, w, b, *, tm, matmul_dtype):
    n, din = x2d.shape
    dout = w.shape[1]
    tm = min(tm, n)
    return pl.pallas_call(
        partial(_linear_kernel, matmul_dtype=matmul_dtype),
        out_shape=jax.ShapeDtypeStruct((n, dout), jnp.float32),
        grid=(pl.cdiv(n, tm),),
        in_specs=[pl.BlockSpec((tm, din), lambda i: (i, 0)),
                  pl.BlockSpec((din, dout), lambda i: (0, 0)),
                  pl.BlockSpec((1, dout), lambda i: (0, 0))],
        out_specs=pl.BlockSpec((tm, dout), lambda i: (i, 0)),
        compiler_params=_cparams(1),
    )(x2d, w.astype(matmul_dtype), b.reshape(1, dout))


def ln_qkv(x2d, g, b, w, bias, *, tm, matmul_dtype):
    n, e = x2d.shape
    d3 = w.shape[1]
    tm = min(tm, n)
    return pl.pallas_call(
        partial(_ln_qkv_kernel, matmul_dtype=matmul_dtype),
        out_shape=jax.ShapeDtypeStruct((n, d3), jnp.float32),
        grid=(pl.cdiv(n, tm),),
        in_specs=[pl.BlockSpec((tm, e), lambda i: (i, 0)),
                  pl.BlockSpec((1, e), lambda i: (0, 0)),
                  pl.BlockSpec((1, e), lambda i: (0, 0)),
                  pl.BlockSpec((e, d3), lambda i: (0, 0)),
                  pl.BlockSpec((1, d3), lambda i: (0, 0))],
        out_specs=pl.BlockSpec((tm, d3), lambda i: (i, 0)),
        compiler_params=_cparams(1),
    )(x2d, g.reshape(1, e), b.reshape(1, e), w.astype(matmul_dtype), bias.reshape(1, d3))


def proj_residual(a2d, r2d, w, b, *, tm, matmul_dtype):
    n, e = a2d.shape
    dout = w.shape[1]
    tm = min(tm, n)
    return pl.pallas_call(
        partial(_proj_residual_kernel, matmul_dtype=matmul_dtype),
        out_shape=jax.ShapeDtypeStruct((n, dout), jnp.float32),
        grid=(pl.cdiv(n, tm),),
        in_specs=[pl.BlockSpec((tm, e), lambda i: (i, 0)),
                  pl.BlockSpec((tm, dout), lambda i: (i, 0)),
                  pl.BlockSpec((e, dout), lambda i: (0, 0)),
                  pl.BlockSpec((1, dout), lambda i: (0, 0))],
        out_specs=pl.BlockSpec((tm, dout), lambda i: (i, 0)),
        compiler_params=_cparams(1),
    )(a2d, r2d, w.astype(matmul_dtype), b.reshape(1, dout))


def ln_ffn(x2d, g, b, w1, b1, w2, b2, *, tm, matmul_dtype):
    n, e = x2d.shape
    f = w1.shape[1]
    tm = min(tm, n)
    return pl.pallas_call(
        partial(_ln_ffn_kernel, matmul_dtype=matmul_dtype),
        out_shape=jax.ShapeDtypeStruct((n, e), jnp.float32),
        grid=(pl.cdiv(n, tm),),
        in_specs=[pl.BlockSpec((tm, e), lambda i: (i, 0)),
                  pl.BlockSpec((1, e), lambda i: (0, 0)),
                  pl.BlockSpec((1, e), lambda i: (0, 0)),
                  pl.BlockSpec((e, f), lambda i: (0, 0)),
                  pl.BlockSpec((1, f), lambda i: (0, 0)),
                  pl.BlockSpec((f, e), lambda i: (0, 0)),
                  pl.BlockSpec((1, e), lambda i: (0, 0))],
        out_specs=pl.BlockSpec((tm, e), lambda i: (i, 0)),
        compiler_params=_cparams(1),
    )(x2d, g.reshape(1, e), b.reshape(1, e),
      w1.astype(matmul_dtype), b1.reshape(1, f),
      w2.astype(matmul_dtype), b2.reshape(1, e))


def attention(qkv3d, tables, *, num_heads, matmul_dtype):
    bsz, t, d3 = qkv3d.shape
    e = d3 // 3
    dh = e // num_heads
    cq, sq, ck, sk = tables
    tab_spec = pl.BlockSpec((t, dh), lambda b: (0, 0))
    return pl.pallas_call(
        partial(_attention_kernel, num_heads=num_heads, matmul_dtype=matmul_dtype),
        out_shape=jax.ShapeDtypeStruct((bsz, t, e), jnp.float32),
        grid=(bsz,),
        in_specs=[pl.BlockSpec((1, t, d3), lambda b: (b, 0, 0)),
                  tab_spec, tab_spec, tab_spec, tab_spec],
        out_specs=pl.BlockSpec((1, t, e), lambda b: (b, 0, 0)),
        compiler_params=_cparams(1),
    )(qkv3d, cq, sq, ck, sk)


def final_head(x3d, g, b, w, bias, *, matmul_dtype):
    bsz, t, e = x3d.shape
    dout = w.shape[1]
    out = pl.pallas_call(
        partial(_final_kernel, matmul_dtype=matmul_dtype),
        out_shape=jax.ShapeDtypeStruct((bsz, 1, dout), jnp.float32),
        grid=(bsz,),
        in_specs=[pl.BlockSpec((1, t, e), lambda i: (i, 0, 0)),
                  pl.BlockSpec((1, e), lambda i: (0, 0)),
                  pl.BlockSpec((1, e), lambda i: (0, 0)),
                  pl.BlockSpec((e, dout), lambda i: (0, 0)),
                  pl.BlockSpec((1, dout), lambda i: (0, 0))],
        out_specs=pl.BlockSpec((1, 1, dout), lambda i: (i, 0, 0)),
        compiler_params=_cparams(1),
    )(x3d, g.reshape(1, e), b.reshape(1, e), w.astype(matmul_dtype), bias.reshape(1, dout))
    return out.reshape(bsz, dout)


# ---------------------------------------------------------------------------
# Glue: rotary tables, parameter init, forward pass
# ---------------------------------------------------------------------------
def rotary_tables(t, dh, scale):
    inv_freq = 1.0 / (10000.0 ** (jnp.arange(0, dh, 2, dtype=jnp.float32) / dh))
    freqs = jnp.outer(jnp.arange(t, dtype=jnp.float32), inv_freq)    # (T, Dh/2)
    emb = jnp.concatenate([freqs, freqs], axis=-1)                   # (T, Dh)
    cos, sin = jnp.cos(emb), jnp.sin(emb)
    sign = jnp.concatenate([-jnp.ones((dh // 2,), jnp.float32),
                            jnp.ones((dh // 2,), jnp.float32)])
    # q tables carry the attention scale (q *= head_dim**-0.5 commutes with rotary);
    # both sin tables carry the rotate_half sign.
    return cos * scale, sin * sign * scale, cos, sin * sign


def _init_linear(key, din, dout, scale=0.02):
    kw, kb = jax.random.split(key)
    # stored as (din, dout) == torch weight (dout, din) transposed, matmul-ready
    w = jax.random.normal(kw, (din, dout), jnp.float32) * scale
    b = jax.random.normal(kb, (dout,), jnp.float32) * scale
    return w, b


def init_params(key, input_dim, output_dim, num_layers, embed_dim):
    keys = jax.random.split(key, 2 + num_layers)
    rw, rb = _init_linear(keys[0], input_dim, embed_dim)
    ow, ob = _init_linear(keys[1], embed_dim, output_dim)
    ffn_dim = embed_dim  # RefinementLayers builds TransformerLayer(embed_dim, embed_dim, ...)
    layers = []
    for i in range(num_layers):
        lk = jax.random.split(keys[2 + i], 6)
        qw, qb = _init_linear(lk[0], embed_dim, embed_dim)
        kw_, kb_ = _init_linear(lk[1], embed_dim, embed_dim)
        vw, vb = _init_linear(lk[2], embed_dim, embed_dim)
        pw, pb = _init_linear(lk[3], embed_dim, embed_dim)
        f1w, f1b = _init_linear(lk[4], embed_dim, ffn_dim)
        f2w, f2b = _init_linear(lk[5], ffn_dim, embed_dim)
        layers.append(dict(
            ln1_w=jnp.ones((embed_dim,), jnp.float32),
            ln1_b=jnp.zeros((embed_dim,), jnp.float32),
            qkv_w=jnp.concatenate([qw, kw_, vw], axis=1),   # (E, 3E) fused projection
            qkv_b=jnp.concatenate([qb, kb_, vb]),
            o_w=pw, o_b=pb,
            ln2_w=jnp.ones((embed_dim,), jnp.float32),
            ln2_b=jnp.zeros((embed_dim,), jnp.float32),
            fc1_w=f1w, fc1_b=f1b, fc2_w=f2w, fc2_b=f2b,
        ))
    return dict(
        resize_w=rw, resize_b=rb,
        layers=layers,
        norm_w=jnp.ones((embed_dim,), jnp.float32),
        norm_b=jnp.zeros((embed_dim,), jnp.float32),
        out_w=ow, out_b=ob,
    )


def refinement_forward(params, input_tensor, num_heads,
                       matmul_dtype=MATMUL_DTYPE, row_tile=ROW_TILE):
    # Matches RefinementLayers.forward with repr_layers=[], need_head_weights=False,
    # return_contacts=False.
    B, T, Din = input_tensor.shape
    E = params["resize_w"].shape[1]
    dh = E // num_heads
    N = B * T

    x = linear_rows(input_tensor.reshape(N, Din), params["resize_w"], params["resize_b"],
                    tm=row_tile, matmul_dtype=matmul_dtype)                    # (N, E)
    tables = rotary_tables(T, dh, dh ** -0.5)

    for lp in params["layers"]:
        # --- self attention block (LN1 + QKV fused; O-proj + residual fused) ---
        qkv = ln_qkv(x, lp["ln1_w"], lp["ln1_b"], lp["qkv_w"], lp["qkv_b"],
                     tm=row_tile, matmul_dtype=matmul_dtype)                   # (N, 3E)
        a = attention(qkv.reshape(B, T, 3 * E), tables,
                      num_heads=num_heads, matmul_dtype=matmul_dtype)          # (B, T, E)
        x = proj_residual(a.reshape(N, E), x, lp["o_w"], lp["o_b"],
                          tm=row_tile, matmul_dtype=matmul_dtype)
        # --- feed forward block (LN2 + fc1 + GELU + fc2 + residual fused) ---
        x = ln_ffn(x, lp["ln2_w"], lp["ln2_b"], lp["fc1_w"], lp["fc1_b"],
                   lp["fc2_w"], lp["fc2_b"], tm=row_tile, matmul_dtype=matmul_dtype)

    out = final_head(x.reshape(B, T, E), params["norm_w"], params["norm_b"],
                     params["out_w"], params["out_b"], matmul_dtype=matmul_dtype)
    # TODO(synk): 'attentions' (need_head_weights / return_contacts path) is not emitted;
    # the default forward path discards attention weights.
    return {"representations": {}, "output": out}


# ---------------------------------------------------------------------------
if __name__ == "__main__":
    B, T = 2, 8
    input_dim, output_dim = 16, 8
    num_layers, embed_dim, attention_heads = 2, 128, 2   # head_dim = 64 (ESM-like)

    key = jax.random.PRNGKey(0)
    kp, kx = jax.random.split(key)
    params = init_params(kp, input_dim, output_dim, num_layers, embed_dim)
    x = jax.random.normal(kx, (B, T, input_dim), jnp.float32)

    fwd = jax.jit(partial(refinement_forward, num_heads=attention_heads))
    result = fwd(params, x)
    jax.block_until_ready(result)

    out = result["output"]
    assert out.shape == (B, output_dim)
    assert out.dtype == jnp.float32
    assert bool(jnp.all(jnp.isfinite(out)))
    print("KERNEL_OK")
</pallas_src>

<mosaic_0001>
module attributes {stable_mosaic.version = 11 : i64} {
  func.func @_linear_kernel(%arg0: i32, %arg1: memref<16x16xf32, #tpu.memory_space<vmem>>, %arg2: memref<16x128xbf16, #tpu.memory_space<vmem>>, %arg3: memref<1x128xf32, #tpu.memory_space<vmem>>, %arg4: memref<16x128xf32, #tpu.memory_space<vmem>>) attributes {dimension_semantics = [#tpu.dimension_semantics<parallel>], iteration_bounds = array<i64: 1>, scalar_prefetch = 0 : i64, scratch_operands = 0 : i64, tpu.core_type = #tpu.core_type<tc>, window_params = [{transform_indices = @transform_0, window_bounds = array<i64: 16, 16>}, {pipeline_mode = #tpu.pipeline_mode<synchronous>, transform_indices = @transform_1, window_bounds = array<i64: 16, 128>}, {pipeline_mode = #tpu.pipeline_mode<synchronous>, transform_indices = @transform_2, window_bounds = array<i64: 1, 128>}, {transform_indices = @transform_3, window_bounds = array<i64: 16, 128>}]} {
    %c0 = arith.constant 0 : index
    %c0_0 = arith.constant 0 : index
    %0 = vector.load %arg1[%c0, %c0_0] : memref<16x16xf32, #tpu.memory_space<vmem>>, vector<16x16xf32>
    %1 = arith.truncf %0 : vector<16x16xf32> to vector<16x16xbf16>
    %c0_1 = arith.constant 0 : index
    %c0_2 = arith.constant 0 : index
    %2 = vector.load %arg2[%c0_1, %c0_2] : memref<16x128xbf16, #tpu.memory_space<vmem>>, vector<16x128xbf16>
    %cst = arith.constant dense<0.000000e+00> : vector<16x128xf32>
    %3 = tpu.matmul %1, %2, %cst {dimension_numbers = #tpu.dot_dimension_numbers<[1], [0], [0], [1], [0, 0, 1, 1], [], []>} : vector<16x16xbf16>, vector<16x128xbf16>, vector<16x128xf32> -> vector<16x128xf32>
    %c0_3 = arith.constant 0 : index
    %c0_4 = arith.constant 0 : index
    %4 = vector.load %arg3[%c0_3, %c0_4] : memref<1x128xf32, #tpu.memory_space<vmem>>, vector<1x128xf32>
    %5 = vector.broadcast %4 : vector<1x128xf32> to vector<16x128xf32>
    %6 = arith.addf %3, %5 : vector<16x128xf32>
    %c0_5 = arith.constant 0 : index
    %c0_6 = arith.constant 0 : index
    %7 = vector.load %arg4[%c0_5, %c0_6] : memref<16x128xf32, #tpu.memory_space<vmem>>, vector<16x128xf32>
    tpu.vector_store %arg4[%c0_5, %c0_6], %6 {strides = array<i32>} : memref<16x128xf32, #tpu.memory_space<vmem>>, vector<16x128xf32>,
    return
  }
  func.func @transform_0(%arg0: i32) -> (i32, i32) {
    %c0_i32 = arith.constant 0 : i32
    %c0_i32_0 = arith.constant 0 : i32
    return %arg0, %c0_i32 : i32, i32
  }
  func.func @transform_1(%arg0: i32) -> (i32, i32) {
    %c0_i32 = arith.constant 0 : i32
    %c0_i32_0 = arith.constant 0 : i32
    %c0_i32_1 = arith.constant 0 : i32
    return %c0_i32, %c0_i32_0 : i32, i32
  }
  func.func @transform_2(%arg0: i32) -> (i32, i32) {
    %c0_i32 = arith.constant 0 : i32
    %c0_i32_0 = arith.constant 0 : i32
    %c0_i32_1 = arith.constant 0 : i32
    return %c0_i32, %c0_i32_0 : i32, i32
  }
  func.func @transform_3(%arg0: i32) -> (i32, i32) {
    %c0_i32 = arith.constant 0 : i32
    %c0_i32_0 = arith.constant 0 : i32
    return %arg0, %c0_i32 : i32, i32
  }
}

module attributes {stable_mosaic.version = 11 : i64} {
  func.func @_ln_qkv_kernel(%arg0: i32, %arg1: memref<16x128xf32, #tpu.memory_space<vmem>>, %arg2: memref<1x128xf32, #tpu.memory_space<vmem>>, %arg3: memref<1x128xf32, #tpu.memory_space<vmem>>, %arg4: memref<128x384xbf16, #tpu.memory_space<vmem>>, %arg5: memref<1x384xf32, #tpu.memory_space<vmem>>, %arg6: memref<16x384xf32, #tpu.memory_space<vmem>>) attributes {dimension_semantics = [#tpu.dimension_semantics<parallel>], iteration_bounds = array<i64: 1>, scalar_prefetch = 0 : i64, scratch_operands = 0 : i64, tpu.core_type = #tpu.core_type<tc>, window_params = [{transform_indices = @transform_0, window_bounds = array<i64: 16, 128>}, {pipeline_mode = #tpu.pipeline_mode<synchronous>, transform_indices = @transform_1, window_bounds = array<i64: 1, 128>}, {pipeline_mode = #tpu.pipeline_mode<synchronous>, transform_indices = @transform_2, window_bounds = array<i64: 1, 128>}, {pipeline_mode = #tpu.pipeline_mode<synchronous>, transform_indices = @transform_3, window_bounds = array<i64: 128, 384>}, {pipeline_mode = #tpu.pipeline_mode<synchronous>, transform_indices = @transform_4, window_bounds = array<i64: 1, 384>}, {transform_indices = @transform_5, window_bounds = array<i64: 16, 384>}]} {
    %c0 = arith.constant 0 : index
    %c0_0 = arith.constant 0 : index
    %0 = vector.load %arg1[%c0, %c0_0] : memref<16x128xf32, #tpu.memory_space<vmem>>, vector<16x128xf32>
    %c0_1 = arith.constant 0 : index
    %c0_2 = arith.constant 0 : index
    %1 = vector.load %arg2[%c0_1, %c0_2] : memref<1x128xf32, #tpu.memory_space<vmem>>, vector<1x128xf32>
    %c0_3 = arith.constant 0 : index
    %c0_4 = arith.constant 0 : index
    %2 = vector.load %arg3[%c0_3, %c0_4] : memref<1x128xf32, #tpu.memory_space<vmem>>, vector<1x128xf32>
    %cst = arith.constant dense<0.000000e+00> : vector<16xf32>
    %3 = vector.multi_reduction <add>, %0, %cst [1] : vector<16x128xf32> to vector<16xf32>
    %4 = vector.shape_cast %3 : vector<16xf32> to vector<16x1xf32>
    %cst_5 = arith.constant 1.280000e+02 : f32
    %5 = vector.broadcast %cst_5 : f32 to vector<16x1xf32>
    %6 = arith.divf %4, %5 : vector<16x1xf32>
    %7 = vector.broadcast %6 : vector<16x1xf32> to vector<16x128xf32>
    %8 = arith.subf %0, %7 : vector<16x128xf32>
    %9 = arith.mulf %8, %8 : vector<16x128xf32>
    %cst_6 = arith.constant dense<0.000000e+00> : vector<16xf32>
    %10 = vector.multi_reduction <add>, %9, %cst_6 [1] : vector<16x128xf32> to vector<16xf32>
    %11 = vector.shape_cast %10 : vector<16xf32> to vector<16x1xf32>
    %cst_7 = arith.constant 1.280000e+02 : f32
    %12 = vector.broadcast %cst_7 : f32 to vector<16x1xf32>
    %13 = arith.divf %11, %12 : vector<16x1xf32>
    %cst_8 = arith.constant 9.99999974E-6 : f32
    %14 = vector.broadcast %cst_8 : f32 to vector<16x1xf32>
    %15 = arith.addf %13, %14 : vector<16x1xf32>
    %16 = math.rsqrt %15 : vector<16x1xf32>
    %17 = vector.broadcast %16 : vector<16x1xf32> to vector<16x128xf32>
    %18 = arith.mulf %8, %17 : vector<16x128xf32>
    %19 = vector.broadcast %1 : vector<1x128xf32> to vector<16x128xf32>
    %20 = arith.mulf %18, %19 : vector<16x128xf32>
    %21 = vector.broadcast %2 : vector<1x128xf32> to vector<16x128xf32>
    %22 = arith.addf %20, %21 : vector<16x128xf32>
    %23 = arith.truncf %22 : vector<16x128xf32> to vector<16x128xbf16>
    %c0_9 = arith.constant 0 : index
    %c0_10 = arith.constant 0 : index
    %24 = vector.load %arg4[%c0_9, %c0_10] : memref<128x384xbf16, #tpu.memory_space<vmem>>, vector<128x384xbf16>
    %cst_11 = arith.constant dense<0.000000e+00> : vector<16x384xf32>
    %25 = tpu.matmul %23, %24, %cst_11 {dimension_numbers = #tpu.dot_dimension_numbers<[1], [0], [0], [1], [0, 0, 1, 1], [], []>} : vector<16x128xbf16>, vector<128x384xbf16>, vector<16x384xf32> -> vector<16x384xf32>
    %c0_12 = arith.constant 0 : index
    %c0_13 = arith.constant 0 : index
    %26 = vector.load %arg5[%c0_12, %c0_13] : memref<1x384xf32, #tpu.memory_space<vmem>>, vector<1x384xf32>
    %27 = vector.broadcast %26 : vector<1x384xf32> to vector<16x384xf32>
    %28 = arith.addf %25, %27 : vector<16x384xf32>
    %c0_14 = arith.constant 0 : index
    %c0_15 = arith.constant 0 : index
    %29 = vector.load %arg6[%c0_14, %c0_15] : memref<16x384xf32, #tpu.memory_space<vmem>>, vector<16x384xf32>
    tpu.vector_store %arg6[%c0_14, %c0_15], %28 {strides = array<i32>} : memref<16x384xf32, #tpu.memory_space<vmem>>, vector<16x384xf32>,
    return
  }
  func.func @transform_0(%arg0: i32) -> (i32, i32) {
    %c0_i32 = arith.constant 0 : i32
    %c0_i32_0 = arith.constant 0 : i32
    return %arg0, %c0_i32 : i32, i32
  }
  func.func @transform_1(%arg0: i32) -> (i32, i32) {
    %c0_i32 = arith.constant 0 : i32
    %c0_i32_0 = arith.constant 0 : i32
    %c0_i32_1 = arith.constant 0 : i32
    return %c0_i32, %c0_i32_0 : i32, i32
  }
  func.func @transform_2(%arg0: i32) -> (i32, i32) {
    %c0_i32 = arith.constant 0 : i32
    %c0_i32_0 = arith.constant 0 : i32
    %c0_i32_1 = arith.constant 0 : i32
    return %c0_i32, %c0_i32_0 : i32, i32
  }
  func.func @transform_3(%arg0: i32) -> (i32, i32) {
    %c0_i32 = arith.constant 0 : i32
    %c0_i32_0 = arith.constant 0 : i32
    %c0_i32_1 = arith.constant 0 : i32
    return %c0_i32, %c0_i32_0 : i32, i32
  }
  func.func @transform_4(%arg0: i32) -> (i32, i32) {
    %c0_i32 = arith.constant 0 : i32
    %c0_i32_0 = arith.constant 0 : i32
    %c0_i32_1 = arith.constant 0 : i32
    return %c0_i32, %c0_i32_0 : i32, i32
  }
  func.func @transform_5(%arg0: i32) -> (i32, i32) {
    %c0_i32 = arith.constant 0 : i32
    %c0_i32_0 = arith.constant 0 : i32
    return %arg0, %c0_i32 : i32, i32
  }
}

module attributes {stable_mosaic.version = 11 : i64} {
  func.func @_attention_kernel(%arg0: i32, %arg1: memref<1x8x384xf32, #tpu.memory_space<vmem>>, %arg2: memref<8x64xf32, #tpu.memory_space<vmem>>, %arg3: memref<8x64xf32, #tpu.memory_space<vmem>>, %arg4: memref<8x64xf32, #tpu.memory_space<vmem>>, %arg5: memref<8x64xf32, #tpu.memory_space<vmem>>, %arg6: memref<1x8x128xf32, #tpu.memory_space<vmem>>) attributes {dimension_semantics = [#tpu.dimension_semantics<parallel>], iteration_bounds = array<i64: 2>, scalar_prefetch = 0 : i64, scratch_operands = 0 : i64, tpu.core_type = #tpu.core_type<tc>, window_params = [{transform_indices = @transform_0, window_bounds = array<i64: 1, 8, 384>}, {pipeline_mode = #tpu.pipeline_mode<synchronous>, transform_indices = @transform_1, window_bounds = array<i64: 8, 64>}, {pipeline_mode = #tpu.pipeline_mode<synchronous>, transform_indices = @transform_2, window_bounds = array<i64: 8, 64>}, {pipeline_mode = #tpu.pipeline_mode<synchronous>, transform_indices = @transform_3, window_bounds = array<i64: 8, 64>}, {pipeline_mode = #tpu.pipeline_mode<synchronous>, transform_indices = @transform_4, window_bounds = array<i64: 8, 64>}, {transform_indices = @transform_5, window_bounds = array<i64: 1, 8, 128>}]} {
    %c0 = arith.constant 0 : index
    %c0_0 = arith.constant 0 : index
    %c0_1 = arith.constant 0 : index
    %0 = vector.load %arg1[%c0, %c0_0, %c0_1] : memref<1x8x384xf32, #tpu.memory_space<vmem>>, vector<1x8x384xf32>
    %1 = vector.shape_cast %0 : vector<1x8x384xf32> to vector<8x384xf32>
    %c0_2 = arith.constant 0 : index
    %c0_3 = arith.constant 0 : index
    %2 = vector.load %arg2[%c0_2, %c0_3] : memref<8x64xf32, #tpu.memory_space<vmem>>, vector<8x64xf32>
    %c0_4 = arith.constant 0 : index
    %c0_5 = arith.constant 0 : index
    %3 = vector.load %arg3[%c0_4, %c0_5] : memref<8x64xf32, #tpu.memory_space<vmem>>, vector<8x64xf32>
    %c0_6 = arith.constant 0 : index
    %c0_7 = arith.constant 0 : index
    %4 = vector.load %arg4[%c0_6, %c0_7] : memref<8x64xf32, #tpu.memory_space<vmem>>, vector<8x64xf32>
    %c0_8 = arith.constant 0 : index
    %c0_9 = arith.constant 0 : index
    %5 = vector.load %arg5[%c0_8, %c0_9] : memref<8x64xf32, #tpu.memory_space<vmem>>, vector<8x64xf32>
    %6 = vector.extract_strided_slice %1 {offsets = [0, 0], sizes = [8, 64], strides = [1, 1]} : vector<8x384xf32> to vector<8x64xf32>
    %7 = vector.extract_strided_slice %1 {offsets = [0, 128], sizes = [8, 64], strides = [1, 1]} : vector<8x384xf32> to vector<8x64xf32>
    %8 = vector.extract_strided_slice %1 {offsets = [0, 256], sizes = [8, 64], strides = [1, 1]} : vector<8x384xf32> to vector<8x64xf32>
    %9 = arith.mulf %6, %2 : vector<8x64xf32>
    %10 = vector.extract_strided_slice %6 {offsets = [0, 32], sizes = [8, 32], strides = [1, 1]} : vector<8x64xf32> to vector<8x32xf32>
    %11 = vector.extract_strided_slice %6 {offsets = [0, 0], sizes = [8, 32], strides = [1, 1]} : vector<8x64xf32> to vector<8x32xf32>
    %12 = tpu.concatenate %10, %11 in 1 : vector<8x32xf32>, vector<8x32xf32> -> vector<8x64xf32>
    %13 = arith.mulf %12, %3 : vector<8x64xf32>
    %14 = arith.addf %9, %13 : vector<8x64xf32>
    %15 = arith.mulf %7, %4 : vector<8x64xf32>
    %16 = vector.extract_strided_slice %7 {offsets = [0, 32], sizes = [8, 32], strides = [1, 1]} : vector<8x64xf32> to vector<8x32xf32>
    %17 = vector.extract_strided_slice %7 {offsets = [0, 0], sizes = [8, 32], strides = [1, 1]} : vector<8x64xf32> to vector<8x32xf32>
    %18 = tpu.concatenate %16, %17 in 1 : vector<8x32xf32>, vector<8x32xf32> -> vector<8x64xf32>
    %19 = arith.mulf %18, %5 : vector<8x64xf32>
    %20 = arith.addf %15, %19 : vector<8x64xf32>
    %21 = arith.truncf %14 : vector<8x64xf32> to vector<8x64xbf16>
    %22 = arith.truncf %20 : vector<8x64xf32> to vector<8x64xbf16>
    %cst = arith.constant dense<0.000000e+00> : vector<8x8xf32>
    %23 = tpu.matmul %21, %22, %cst {dimension_numbers = #tpu.dot_dimension_numbers<[1], [1], [0], [0], [0, 0, 1, 0], [], []>} : vector<8x64xbf16>, vector<8x64xbf16>, vector<8x8xf32> -> vector<8x8xf32>
    %cst_10 = arith.constant dense<0xFF800000> : vector<8xf32>
    %24 = vector.multi_reduction <maximumf>, %23, %cst_10 [1] : vector<8x8xf32> to vector<8xf32>
    %25 = vector.shape_cast %24 : vector<8xf32> to vector<8x1xf32>
    %26 = vector.broadcast %25 : vector<8x1xf32> to vector<8x8xf32>
    %27 = arith.subf %23, %26 : vector<8x8xf32>
    %28 = math.exp %27 : vector<8x8xf32>
    %cst_11 = arith.constant dense<0.000000e+00> : vector<8xf32>
    %29 = vector.multi_reduction <add>, %28, %cst_11 [1] : vector<8x8xf32> to vector<8xf32>
    %30 = vector.shape_cast %29 : vector<8xf32> to vector<8x1xf32>
    %31 = tpu.reciprocal %30 {approx = true} : vector<8x1xf32> -> vector<8x1xf32>
    %32 = arith.truncf %28 : vector<8x8xf32> to vector<8x8xbf16>
    %33 = arith.truncf %8 : vector<8x64xf32> to vector<8x64xbf16>
    %cst_12 = arith.constant dense<0.000000e+00> : vector<8x64xf32>
    %34 = tpu.matmul %32, %33, %cst_12 {dimension_numbers = #tpu.dot_dimension_numbers<[1], [0], [0], [1], [0, 0, 1, 1], [], []>} : vector<8x8xbf16>, vector<8x64xbf16>, vector<8x64xf32> -> vector<8x64xf32>
    %35 = vector.broadcast %31 : vector<8x1xf32> to vector<8x64xf32>
    %36 = arith.mulf %34, %35 : vector<8x64xf32>
    %37 = vector.extract_strided_slice %1 {offsets = [0, 64], sizes = [8, 64], strides = [1, 1]} : vector<8x384xf32> to vector<8x64xf32>
    %38 = vector.extract_strided_slice %1 {offsets = [0, 192], sizes = [8, 64], strides = [1, 1]} : vector<8x384xf32> to vector<8x64xf32>
    %39 = vector.extract_strided_slice %1 {offsets = [0, 320], sizes = [8, 64], strides = [1, 1]} : vector<8x384xf32> to vector<8x64xf32>
    %40 = arith.mulf %37, %2 : vector<8x64xf32>
    %41 = vector.extract_strided_slice %37 {offsets = [0, 32], sizes = [8, 32], strides = [1, 1]} : vector<8x64xf32> to vector<8x32xf32>
    %42 = vector.extract_strided_slice %37 {offsets = [0, 0], sizes = [8, 32], strides = [1, 1]} : vector<8x64xf32> to vector<8x32xf32>
    %43 = tpu.concatenate %41, %42 in 1 : vector<8x32xf32>, vector<8x32xf32> -> vector<8x64xf32>
    %44 = arith.mulf %43, %3 : vector<8x64xf32>
    %45 = arith.addf %40, %44 : vector<8x64xf32>
    %46 = arith.mulf %38, %4 : vector<8x64xf32>
    %47 = vector.extract_strided_slice %38 {offsets = [0, 32], sizes = [8, 32], strides = [1, 1]} : vector<8x64xf32> to vector<8x32xf32>
    %48 = vector.extract_strided_slice %38 {offsets = [0, 0], sizes = [8, 32], strides = [1, 1]} : vector<8x64xf32> to vector<8x32xf32>
    %49 = tpu.concatenate %47, %48 in 1 : vector<8x32xf32>, vector<8x32xf32> -> vector<8x64xf32>
    %50 = arith.mulf %49, %5 : vector<8x64xf32>
    %51 = arith.addf %46, %50 : vector<8x64xf32>
    %52 = arith.truncf %45 : vector<8x64xf32> to vector<8x64xbf16>
    %53 = arith.truncf %51 : vector<8x64xf32> to vector<8x64xbf16>
    %cst_13 = arith.constant dense<0.000000e+00> : vector<8x8xf32>
    %54 = tpu.matmul %52, %53, %cst_13 {dimension_numbers = #tpu.dot_dimension_numbers<[1], [1], [0], [0], [0, 0, 1, 0], [], []>} : vector<8x64xbf16>, vector<8x64xbf16>, vector<8x8xf32> -> vector<8x8xf32>
    %cst_14 = arith.constant dense<0xFF800000> : vector<8xf32>
    %55 = vector.multi_reduction <maximumf>, %54, %cst_14 [1] : vector<8x8xf32> to vector<8xf32>
    %56 = vector.shape_cast %55 : vector<8xf32> to vector<8x1xf32>
    %57 = vector.broadcast %56 : vector<8x1xf32> to vector<8x8xf32>
    %58 = arith.subf %54, %57 : vector<8x8xf32>
    %59 = math.exp %58 : vector<8x8xf32>
    %cst_15 = arith.constant dense<0.000000e+00> : vector<8xf32>
    %60 = vector.multi_reduction <add>, %59, %cst_15 [1] : vector<8x8xf32> to vector<8xf32>
    %61 = vector.shape_cast %60 : vector<8xf32> to vector<8x1xf32>
    %62 = tpu.reciprocal %61 {approx = true} : vector<8x1xf32> -> vector<8x1xf32>
    %63 = arith.truncf %59 : vector<8x8xf32> to vector<8x8xbf16>
    %64 = arith.truncf %39 : vector<8x64xf32> to vector<8x64xbf16>
    %cst_16 = arith.constant dense<0.000000e+00> : vector<8x64xf32>
    %65 = tpu.matmul %63, %64, %cst_16 {dimension_numbers = #tpu.dot_dimension_numbers<[1], [0], [0], [1], [0, 0, 1, 1], [], []>} : vector<8x8xbf16>, vector<8x64xbf16>, vector<8x64xf32> -> vector<8x64xf32>
    %66 = vector.broadcast %62 : vector<8x1xf32> to vector<8x64xf32>
    %67 = arith.mulf %65, %66 : vector<8x64xf32>
    %68 = tpu.concatenate %36, %67 in 1 : vector<8x64xf32>, vector<8x64xf32> -> vector<8x128xf32>
    %c0_17 = arith.constant 0 : index
    %c0_18 = arith.constant 0 : index
    %c0_19 = arith.constant 0 : index
    %69 = vector.load %arg6[%c0_17, %c0_18, %c0_19] : memref<1x8x128xf32, #tpu.memory_space<vmem>>, vector<1x8x128xf32>
    %70 = vector.shape_cast %69 : vector<1x8x128xf32> to vector<8x128xf32>
    %71 = vector.shape_cast %68 : vector<8x128xf32> to vector<1x8x128xf32>
    tpu.vector_store %arg6[%c0_17, %c0_18, %c0_19], %71 {strides = array<i32>} : memref<1x8x128xf32, #tpu.memory_space<vmem>>, vector<1x8x128xf32>,
    return
  }
  func.func @transform_0(%arg0: i32) -> (i32, i32, i32) {
    %c0_i32 = arith.constant 0 : i32
    %c0_i32_0 = arith.constant 0 : i32
    %c0_i32_1 = arith.constant 0 : i32
    return %arg0, %c0_i32, %c0_i32_0 : i32, i32, i32
  }
  func.func @transform_1(%arg0: i32) -> (i32, i32) {
    %c0_i32 = arith.constant 0 : i32
    %c0_i32_0 = arith.constant 0 : i32
    %c0_i32_1 = arith.constant 0 : i32
    return %c0_i32, %c0_i32_0 : i32, i32
  }
  func.func @transform_2(%arg0: i32) -> (i32, i32) {
    %c0_i32 = arith.constant 0 : i32
    %c0_i32_0 = arith.constant 0 : i32
    %c0_i32_1 = arith.constant 0 : i32
    return %c0_i32, %c0_i32_0 : i32, i32
  }
  func.func @transform_3(%arg0: i32) -> (i32, i32) {
    %c0_i32 = arith.constant 0 : i32
    %c0_i32_0 = arith.constant 0 : i32
    %c0_i32_1 = arith.constant 0 : i32
    return %c0_i32, %c0_i32_0 : i32, i32
  }
  func.func @transform_4(%arg0: i32) -> (i32, i32) {
    %c0_i32 = arith.constant 0 : i32
    %c0_i32_0 = arith.constant 0 : i32
    %c0_i32_1 = arith.constant 0 : i32
    return %c0_i32, %c0_i32_0 : i32, i32
  }
  func.func @transform_5(%arg0: i32) -> (i32, i32, i32) {
    %c0_i32 = arith.constant 0 : i32
    %c0_i32_0 = arith.constant 0 : i32
    %c0_i32_1 = arith.constant 0 : i32
    return %arg0, %c0_i32, %c0_i32_0 : i32, i32, i32
  }
}

module attributes {stable_mosaic.version = 11 : i64} {
  func.func @_proj_residual_kernel(%arg0: i32, %arg1: memref<16x128xf32, #tpu.memory_space<vmem>>, %arg2: memref<16x128xf32, #tpu.memory_space<vmem>>, %arg3: memref<128x128xbf16, #tpu.memory_space<vmem>>, %arg4: memref<1x128xf32, #tpu.memory_space<vmem>>, %arg5: memref<16x128xf32, #tpu.memory_space<vmem>>) attributes {dimension_semantics = [#tpu.dimension_semantics<parallel>], iteration_bounds = array<i64: 1>, scalar_prefetch = 0 : i64, scratch_operands = 0 : i64, tpu.core_type = #tpu.core_type<tc>, window_params = [{transform_indices = @transform_0, window_bounds = array<i64: 16, 128>}, {transform_indices = @transform_1, window_bounds = array<i64: 16, 128>}, {pipeline_mode = #tpu.pipeline_mode<synchronous>, transform_indices = @transform_2, window_bounds = array<i64: 128, 128>}, {pipeline_mode = #tpu.pipeline_mode<synchronous>, transform_indices = @transform_3, window_bounds = array<i64: 1, 128>}, {transform_indices = @transform_4, window_bounds = array<i64: 16, 128>}]} {
    %c0 = arith.constant 0 : index
    %c0_0 = arith.constant 0 : index
    %0 = vector.load %arg1[%c0, %c0_0] : memref<16x128xf32, #tpu.memory_space<vmem>>, vector<16x128xf32>
    %1 = arith.truncf %0 : vector<16x128xf32> to vector<16x128xbf16>
    %c0_1 = arith.constant 0 : index
    %c0_2 = arith.constant 0 : index
    %2 = vector.load %arg3[%c0_1, %c0_2] : memref<128x128xbf16, #tpu.memory_space<vmem>>, vector<128x128xbf16>
    %cst = arith.constant dense<0.000000e+00> : vector<16x128xf32>
    %3 = tpu.matmul %1, %2, %cst {dimension_numbers = #tpu.dot_dimension_numbers<[1], [0], [0], [1], [0, 0, 1, 1], [], []>} : vector<16x128xbf16>, vector<128x128xbf16>, vector<16x128xf32> -> vector<16x128xf32>
    %c0_3 = arith.constant 0 : index
    %c0_4 = arith.constant 0 : index
    %4 = vector.load %arg4[%c0_3, %c0_4] : memref<1x128xf32, #tpu.memory_space<vmem>>, vector<1x128xf32>
    %5 = vector.broadcast %4 : vector<1x128xf32> to vector<16x128xf32>
    %6 = arith.addf %3, %5 : vector<16x128xf32>
    %c0_5 = arith.constant 0 : index
    %c0_6 = arith.constant 0 : index
    %7 = vector.load %arg2[%c0_5, %c0_6] : memref<16x128xf32, #tpu.memory_space<vmem>>, vector<16x128xf32>
    %8 = arith.addf %7, %6 : vector<16x128xf32>
    %c0_7 = arith.constant 0 : index
    %c0_8 = arith.constant 0 : index
    %9 = vector.load %arg5[%c0_7, %c0_8] : memref<16x128xf32, #tpu.memory_space<vmem>>, vector<16x128xf32>
    tpu.vector_store %arg5[%c0_7, %c0_8], %8 {strides = array<i32>} : memref<16x128xf32, #tpu.memory_space<vmem>>, vector<16x128xf32>,
    return
  }
  func.func @transform_0(%arg0: i32) -> (i32, i32) {
    %c0_i32 = arith.constant 0 : i32
    %c0_i32_0 = arith.constant 0 : i32
    return %arg0, %c0_i32 : i32, i32
  }
  func.func @transform_1(%arg0: i32) -> (i32, i32) {
    %c0_i32 = arith.constant 0 : i32
    %c0_i32_0 = arith.constant 0 : i32
    return %arg0, %c0_i32 : i32, i32
  }
  func.func @transform_2(%arg0: i32) -> (i32, i32) {
    %c0_i32 = arith.constant 0 : i32
    %c0_i32_0 = arith.constant 0 : i32
    %c0_i32_1 = arith.constant 0 : i32
    return %c0_i32, %c0_i32_0 : i32, i32
  }
  func.func @transform_3(%arg0: i32) -> (i32, i32) {
    %c0_i32 = arith.constant 0 : i32
    %c0_i32_0 = arith.constant 0 : i32
    %c0_i32_1 = arith.constant 0 : i32
    return %c0_i32, %c0_i32_0 : i32, i32
  }
  func.func @transform_4(%arg0: i32) -> (i32, i32) {
    %c0_i32 = arith.constant 0 : i32
    %c0_i32_0 = arith.constant 0 : i32
    return %arg0, %c0_i32 : i32, i32
  }
}

module attributes {stable_mosaic.version = 11 : i64} {
  func.func @_ln_ffn_kernel(%arg0: i32, %arg1: memref<16x128xf32, #tpu.memory_space<vmem>>, %arg2: memref<1x128xf32, #tpu.memory_space<vmem>>, %arg3: memref<1x128xf32, #tpu.memory_space<vmem>>, %arg4: memref<128x128xbf16, #tpu.memory_space<vmem>>, %arg5: memref<1x128xf32, #tpu.memory_space<vmem>>, %arg6: memref<128x128xbf16, #tpu.memory_space<vmem>>, %arg7: memref<1x128xf32, #tpu.memory_space<vmem>>, %arg8: memref<16x128xf32, #tpu.memory_space<vmem>>) attributes {dimension_semantics = [#tpu.dimension_semantics<parallel>], iteration_bounds = array<i64: 1>, scalar_prefetch = 0 : i64, scratch_operands = 0 : i64, tpu.core_type = #tpu.core_type<tc>, window_params = [{transform_indices = @transform_0, window_bounds = array<i64: 16, 128>}, {pipeline_mode = #tpu.pipeline_mode<synchronous>, transform_indices = @transform_1, window_bounds = array<i64: 1, 128>}, {pipeline_mode = #tpu.pipeline_mode<synchronous>, transform_indices = @transform_2, window_bounds = array<i64: 1, 128>}, {pipeline_mode = #tpu.pipeline_mode<synchronous>, transform_indices = @transform_3, window_bounds = array<i64: 128, 128>}, {pipeline_mode = #tpu.pipeline_mode<synchronous>, transform_indices = @transform_4, window_bounds = array<i64: 1, 128>}, {pipeline_mode = #tpu.pipeline_mode<synchronous>, transform_indices = @transform_5, window_bounds = array<i64: 128, 128>}, {pipeline_mode = #tpu.pipeline_mode<synchronous>, transform_indices = @transform_6, window_bounds = array<i64: 1, 128>}, {transform_indices = @transform_7, window_bounds = array<i64: 16, 128>}]} {
    %c0 = arith.constant 0 : index
    %c0_0 = arith.constant 0 : index
    %0 = vector.load %arg1[%c0, %c0_0] : memref<16x128xf32, #tpu.memory_space<vmem>>, vector<16x128xf32>
    %c0_1 = arith.constant 0 : index
    %c0_2 = arith.constant 0 : index
    %1 = vector.load %arg2[%c0_1, %c0_2] : memref<1x128xf32, #tpu.memory_space<vmem>>, vector<1x128xf32>
    %c0_3 = arith.constant 0 : index
    %c0_4 = arith.constant 0 : index
    %2 = vector.load %arg3[%c0_3, %c0_4] : memref<1x128xf32, #tpu.memory_space<vmem>>, vector<1x128xf32>
    %cst = arith.constant dense<0.000000e+00> : vector<16xf32>
    %3 = vector.multi_reduction <add>, %0, %cst [1] : vector<16x128xf32> to vector<16xf32>
    %4 = vector.shape_cast %3 : vector<16xf32> to vector<16x1xf32>
    %cst_5 = arith.constant 1.280000e+02 : f32
    %5 = vector.broadcast %cst_5 : f32 to vector<16x1xf32>
    %6 = arith.divf %4, %5 : vector<16x1xf32>
    %7 = vector.broadcast %6 : vector<16x1xf32> to vector<16x128xf32>
    %8 = arith.subf %0, %7 : vector<16x128xf32>
    %9 = arith.mulf %8, %8 : vector<16x128xf32>
    %cst_6 = arith.constant dense<0.000000e+00> : vector<16xf32>
    %10 = vector.multi_reduction <add>, %9, %cst_6 [1] : vector<16x128xf32> to vector<16xf32>
    %11 = vector.shape_cast %10 : vector<16xf32> to vector<16x1xf32>
    %cst_7 = arith.constant 1.280000e+02 : f32
    %12 = vector.broadcast %cst_7 : f32 to vector<16x1xf32>
    %13 = arith.divf %11, %12 : vector<16x1xf32>
    %cst_8 = arith.constant 9.99999974E-6 : f32
    %14 = vector.broadcast %cst_8 : f32 to vector<16x1xf32>
    %15 = arith.addf %13, %14 : vector<16x1xf32>
    %16 = math.rsqrt %15 : vector<16x1xf32>
    %17 = vector.broadcast %16 : vector<16x1xf32> to vector<16x128xf32>
    %18 = arith.mulf %8, %17 : vector<16x128xf32>
    %19 = vector.broadcast %1 : vector<1x128xf32> to vector<16x128xf32>
    %20 = arith.mulf %18, %19 : vector<16x128xf32>
    %21 = vector.broadcast %2 : vector<1x128xf32> to vector<16x128xf32>
    %22 = arith.addf %20, %21 : vector<16x128xf32>
    %23 = arith.truncf %22 : vector<16x128xf32> to vector<16x128xbf16>
    %c0_9 = arith.constant 0 : index
    %c0_10 = arith.constant 0 : index
    %24 = vector.load %arg4[%c0_9, %c0_10] : memref<128x128xbf16, #tpu.memory_space<vmem>>, vector<128x128xbf16>
    %cst_11 = arith.constant dense<0.000000e+00> : vector<16x128xf32>
    %25 = tpu.matmul %23, %24, %cst_11 {dimension_numbers = #tpu.dot_dimension_numbers<[1], [0], [0], [1], [0, 0, 1, 1], [], []>} : vector<16x128xbf16>, vector<128x128xbf16>, vector<16x128xf32> -> vector<16x128xf32>
    %c0_12 = arith.constant 0 : index
    %c0_13 = arith.constant 0 : index
    %26 = vector.load %arg5[%c0_12, %c0_13] : memref<1x128xf32, #tpu.memory_space<vmem>>, vector<1x128xf32>
    %27 = vector.broadcast %26 : vector<1x128xf32> to vector<16x128xf32>
    %28 = arith.addf %25, %27 : vector<16x128xf32>
    %cst_14 = arith.constant 5.000000e-01 : f32
    %29 = vector.broadcast %cst_14 : f32 to vector<16x128xf32>
    %30 = arith.mulf %28, %29 : vector<16x128xf32>
    %cst_15 = arith.constant 0.707106769 : f32
    %31 = vector.broadcast %cst_15 : f32 to vector<16x128xf32>
    %32 = arith.mulf %28, %31 : vector<16x128xf32>
    %33 = math.erf %32 : vector<16x128xf32>
    %cst_16 = arith.constant 1.000000e+00 : f32
    %34 = vector.broadcast %cst_16 : f32 to vector<16x128xf32>
    %35 = arith.addf %34, %33 : vector<16x128xf32>
    %36 = arith.mulf %30, %35 : vector<16x128xf32>
    %37 = arith.truncf %36 : vector<16x128xf32> to vector<16x128xbf16>
    %c0_17 = arith.constant 0 : index
    %c0_18 = arith.constant 0 : index
    %38 = vector.load %arg6[%c0_17, %c0_18] : memref<128x128xbf16, #tpu.memory_space<vmem>>, vector<128x128xbf16>
    %cst_19 = arith.constant dense<0.000000e+00> : vector<16x128xf32>
    %39 = tpu.matmul %37, %38, %cst_19 {dimension_numbers = #tpu.dot_dimension_numbers<[1], [0], [0], [1], [0, 0, 1, 1], [], []>} : vector<16x128xbf16>, vector<128x128xbf16>, vector<16x128xf32> -> vector<16x128xf32>
    %c0_20 = arith.constant 0 : index
    %c0_21 = arith.constant 0 : index
    %40 = vector.load %arg7[%c0_20, %c0_21] : memref<1x128xf32, #tpu.memory_space<vmem>>, vector<1x128xf32>
    %41 = vector.broadcast %40 : vector<1x128xf32> to vector<16x128xf32>
    %42 = arith.addf %39, %41 : vector<16x128xf32>
    %43 = arith.addf %0, %42 : vector<16x128xf32>
    %c0_22 = arith.constant 0 : index
    %c0_23 = arith.constant 0 : index
    %44 = vector.load %arg8[%c0_22, %c0_23] : memref<16x128xf32, #tpu.memory_space<vmem>>, vector<16x128xf32>
    tpu.vector_store %arg8[%c0_22, %c0_23], %43 {strides = array<i32>} : memref<16x128xf32, #tpu.memory_space<vmem>>, vector<16x128xf32>,
    return
  }
  func.func @transform_0(%arg0: i32) -> (i32, i32) {
    %c0_i32 = arith.constant 0 : i32
    %c0_i32_0 = arith.constant 0 : i32
    return %arg0, %c0_i32 : i32, i32
  }
  func.func @transform_1(%arg0: i32) -> (i32, i32) {
    %c0_i32 = arith.constant 0 : i32
    %c0_i32_0 = arith.constant 0 : i32
    %c0_i32_1 = arith.constant 0 : i32
    return %c0_i32, %c0_i32_0 : i32, i32
  }
  func.func @transform_2(%arg0: i32) -> (i32, i32) {
    %c0_i32 = arith.constant 0 : i32
    %c0_i32_0 = arith.constant 0 : i32
    %c0_i32_1 = arith.constant 0 : i32
    return %c0_i32, %c0_i32_0 : i32, i32
  }
  func.func @transform_3(%arg0: i32) -> (i32, i32) {
    %c0_i32 = arith.constant 0 : i32
    %c0_i32_0 = arith.constant 0 : i32
    %c0_i32_1 = arith.constant 0 : i32
    return %c0_i32, %c0_i32_0 : i32, i32
  }
  func.func @transform_4(%arg0: i32) -> (i32, i32) {
    %c0_i32 = arith.constant 0 : i32
    %c0_i32_0 = arith.constant 0 : i32
    %c0_i32_1 = arith.constant 0 : i32
    return %c0_i32, %c0_i32_0 : i32, i32
  }
  func.func @transform_5(%arg0: i32) -> (i32, i32) {
    %c0_i32 = arith.constant 0 : i32
    %c0_i32_0 = arith.constant 0 : i32
    %c0_i32_1 = arith.constant 0 : i32
    return %c0_i32, %c0_i32_0 : i32, i32
  }
  func.func @transform_6(%arg0: i32) -> (i32, i32) {
    %c0_i32 = arith.constant 0 : i32
    %c0_i32_0 = arith.constant 0 : i32
    %c0_i32_1 = arith.constant 0 : i32
    return %c0_i32, %c0_i32_0 : i32, i32
  }
  func.func @transform_7(%arg0: i32) -> (i32, i32) {
    %c0_i32 = arith.constant 0 : i32
    %c0_i32_0 = arith.constant 0 : i32
    return %arg0, %c0_i32 : i32, i32
  }
}

module attributes {stable_mosaic.version = 11 : i64} {
  func.func @_final_kernel(%arg0: i32, %arg1: memref<1x8x128xf32, #tpu.memory_space<vmem>>, %arg2: memref<1x128xf32, #tpu.memory_space<vmem>>, %arg3: memref<1x128xf32, #tpu.memory_space<vmem>>, %arg4: memref<128x8xbf16, #tpu.memory_space<vmem>>, %arg5: memref<1x8xf32, #tpu.memory_space<vmem>>, %arg6: memref<1x1x8xf32, #tpu.memory_space<vmem>>) attributes {dimension_semantics = [#tpu.dimension_semantics<parallel>], iteration_bounds = array<i64: 2>, scalar_prefetch = 0 : i64, scratch_operands = 0 : i64, tpu.core_type = #tpu.core_type<tc>, window_params = [{transform_indices = @transform_0, window_bounds = array<i64: 1, 8, 128>}, {pipeline_mode = #tpu.pipeline_mode<synchronous>, transform_indices = @transform_1, window_bounds = array<i64: 1, 128>}, {pipeline_mode = #tpu.pipeline_mode<synchronous>, transform_indices = @transform_2, window_bounds = array<i64: 1, 128>}, {pipeline_mode = #tpu.pipeline_mode<synchronous>, transform_indices = @transform_3, window_bounds = array<i64: 128, 8>}, {pipeline_mode = #tpu.pipeline_mode<synchronous>, transform_indices = @transform_4, window_bounds = array<i64: 1, 8>}, {transform_indices = @transform_5, window_bounds = array<i64: 1, 1, 8>}]} {
    %c0 = arith.constant 0 : index
    %c0_0 = arith.constant 0 : index
    %c0_1 = arith.constant 0 : index
    %0 = vector.load %arg1[%c0, %c0_0, %c0_1] : memref<1x8x128xf32, #tpu.memory_space<vmem>>, vector<1x8x128xf32>
    %1 = vector.shape_cast %0 : vector<1x8x128xf32> to vector<8x128xf32>
    %c0_2 = arith.constant 0 : index
    %c0_3 = arith.constant 0 : index
    %2 = vector.load %arg2[%c0_2, %c0_3] : memref<1x128xf32, #tpu.memory_space<vmem>>, vector<1x128xf32>
    %c0_4 = arith.constant 0 : index
    %c0_5 = arith.constant 0 : index
    %3 = vector.load %arg3[%c0_4, %c0_5] : memref<1x128xf32, #tpu.memory_space<vmem>>, vector<1x128xf32>
    %cst = arith.constant dense<0.000000e+00> : vector<8xf32>
    %4 = vector.multi_reduction <add>, %1, %cst [1] : vector<8x128xf32> to vector<8xf32>
    %5 = vector.shape_cast %4 : vector<8xf32> to vector<8x1xf32>
    %cst_6 = arith.constant 1.280000e+02 : f32
    %6 = vector.broadcast %cst_6 : f32 to vector<8x1xf32>
    %7 = arith.divf %5, %6 : vector<8x1xf32>
    %8 = vector.broadcast %7 : vector<8x1xf32> to vector<8x128xf32>
    %9 = arith.subf %1, %8 : vector<8x128xf32>
    %10 = arith.mulf %9, %9 : vector<8x128xf32>
    %cst_7 = arith.constant dense<0.000000e+00> : vector<8xf32>
    %11 = vector.multi_reduction <add>, %10, %cst_7 [1] : vector<8x128xf32> to vector<8xf32>
    %12 = vector.shape_cast %11 : vector<8xf32> to vector<8x1xf32>
    %cst_8 = arith.constant 1.280000e+02 : f32
    %13 = vector.broadcast %cst_8 : f32 to vector<8x1xf32>
    %14 = arith.divf %12, %13 : vector<8x1xf32>
    %cst_9 = arith.constant 9.99999974E-6 : f32
    %15 = vector.broadcast %cst_9 : f32 to vector<8x1xf32>
    %16 = arith.addf %14, %15 : vector<8x1xf32>
    %17 = math.rsqrt %16 : vector<8x1xf32>
    %18 = vector.broadcast %17 : vector<8x1xf32> to vector<8x128xf32>
    %19 = arith.mulf %9, %18 : vector<8x128xf32>
    %20 = vector.broadcast %2 : vector<1x128xf32> to vector<8x128xf32>
    %21 = arith.mulf %19, %20 : vector<8x128xf32>
    %22 = vector.broadcast %3 : vector<1x128xf32> to vector<8x128xf32>
    %23 = arith.addf %21, %22 : vector<8x128xf32>
    %cst_10 = arith.constant dense<0.000000e+00> : vector<128xf32>
    %24 = vector.multi_reduction <add>, %23, %cst_10 [0] : vector<8x128xf32> to vector<128xf32>
    %25 = vector.shape_cast %24 : vector<128xf32> to vector<1x128xf32>
    %cst_11 = arith.constant 8.000000e+00 : f32
    %26 = vector.broadcast %cst_11 : f32 to vector<1x128xf32>
    %27 = arith.divf %25, %26 : vector<1x128xf32>
    %28 = arith.truncf %27 : vector<1x128xf32> to vector<1x128xbf16>
    %c0_12 = arith.constant 0 : index
    %c0_13 = arith.constant 0 : index
    %29 = vector.load %arg4[%c0_12, %c0_13] : memref<128x8xbf16, #tpu.memory_space<vmem>>, vector<128x8xbf16>
    %cst_14 = arith.constant dense<0.000000e+00> : vector<1x8xf32>
    %30 = tpu.matmul %28, %29, %cst_14 {dimension_numbers = #tpu.dot_dimension_numbers<[1], [0], [0], [1], [0, 0, 1, 1], [], []>} : vector<1x128xbf16>, vector<128x8xbf16>, vector<1x8xf32> -> vector<1x8xf32>
    %c0_15 = arith.constant 0 : index
    %c0_16 = arith.constant 0 : index
    %31 = vector.load %arg5[%c0_15, %c0_16] : memref<1x8xf32, #tpu.memory_space<vmem>>, vector<1x8xf32>
    %32 = arith.addf %30, %31 : vector<1x8xf32>
    %c0_17 = arith.constant 0 : index
    %c0_18 = arith.constant 0 : index
    %c0_19 = arith.constant 0 : index
    %33 = vector.load %arg6[%c0_17, %c0_18, %c0_19] : memref<1x1x8xf32, #tpu.memory_space<vmem>>, vector<1x1x8xf32>
    %34 = vector.shape_cast %33 : vector<1x1x8xf32> to vector<1x8xf32>
    %35 = vector.shape_cast %32 : vector<1x8xf32> to vector<1x1x8xf32>
    tpu.vector_store %arg6[%c0_17, %c0_18, %c0_19], %35 {strides = array<i32>} : memref<1x1x8xf32, #tpu.memory_space<vmem>>, vector<1x1x8xf32>,
    return
  }
  func.func @transform_0(%arg0: i32) -> (i32, i32, i32) {
    %c0_i32 = arith.constant 0 : i32
    %c0_i32_0 = arith.constant 0 : i32
    %c0_i32_1 = arith.constant 0 : i32
    return %arg0, %c0_i32, %c0_i32_0 : i32, i32, i32
  }
  func.func @transform_1(%arg0: i32) -> (i32, i32) {
    %c0_i32 = arith.constant 0 : i32
    %c0_i32_0 = arith.constant 0 : i32
    %c0_i32_1 = arith.constant 0 : i32
    return %c0_i32, %c0_i32_0 : i32, i32
  }
  func.func @transform_2(%arg0: i32) -> (i32, i32) {
    %c0_i32 = arith.constant 0 : i32
    %c0_i32_0 = arith.constant 0 : i32
    %c0_i32_1 = arith.constant 0 : i32
    return %c0_i32, %c0_i32_0 : i32, i32
  }
  func.func @transform_3(%arg0: i32) -> (i32, i32) {
    %c0_i32 = arith.constant 0 : i32
    %c0_i32_0 = arith.constant 0 : i32
    %c0_i32_1 = arith.constant 0 : i32
    return %c0_i32, %c0_i32_0 : i32, i32
  }
  func.func @transform_4(%arg0: i32) -> (i32, i32) {
    %c0_i32 = arith.constant 0 : i32
    %c0_i32_0 = arith.constant 0 : i32
    %c0_i32_1 = arith.constant 0 : i32
    return %c0_i32, %c0_i32_0 : i32, i32
  }
  func.func @transform_5(%arg0: i32) -> (i32, i32, i32) {
    %c0_i32 = arith.constant 0 : i32
    %c0_i32_0 = arith.constant 0 : i32
    %c0_i32_1 = arith.constant 0 : i32
    return %arg0, %c0_i32, %c0_i32_0 : i32, i32, i32
  }
}

</mosaic_0001>

<bundles_post_ra>
// kernel: refinement_forward.10
= control target key start
LH: loop header
LB: loop body
LE: loop exit
PB: predicated region body
PF: predicated region fallthrough
CT: control target
= control target key end

     0   :  { %vm30_vm0 = vcmask 130048   ;;  %s99_s1 = inlined_call_operand.vmem [shape: bf16[16,128], index: 1, kind: input, shape index: {}]   ;;  %s100_s0 = inlined_call_operand.vmem [shape: f32[16,16], index: 0, kind: input, shape index: {}]   ;;  %s101_s2 = inlined_call_operand.vmem [shape: f32[1,128], index: 2, kind: input, shape index: {}]   ;;  %s102_s3 = inlined_call_operand.vmem [shape: f32[16,128], index: 3, kind: output, shape index: {}]  }
   0x1   :  { %v59_v0 = vld [vmem:[%s99_s1] sm:$0xff]  ;;  %v16_v2 = vld [vmem:[%s100_s0 + $0x8] sm:$0xff] }
   0x2   :  { %v15_v1 = vld [vmem:[%s100_s0] sm:$0xff]  ;;  %41 = vmatpush.bf16.msra.mxu0 %v59_v0 }
   0x3   :  { %v17_v3 = vpack.c.bf16 %v16_v2, %v15_v1  ;;  %v60_v4 = vld [vmem:[%s101_s2] ss:$0 sm:$0xff] }
   0x5   :  { %58 = vmatmul.msk.bf16.vlgmr.msra.gmra.mxu0 %vm30_vm0, %v17_v3 }
  0x82   :  { %v43_v5 = vpop.f32.mrf.mxu0 }
  0x83   :  { %v44_v6 = vadd.f32 %v60_v4, %v43_v5 }
  0x85   :  { %48 = vst [vmem:[%s102_s3] sm:$0xff] %v44_v6 }
  0x8a   :  { %v45_v7 = vpop.f32.mrf.mxu0 }
  0x8b   :  { %v46_v8 = vadd.f32 %v60_v4, %v45_v7 }
  0x8d   :  { %49 = vst [vmem:[%s102_s3 + $0x8] sm:$0xff] %v46_v8 }

// kernel: refinement_forward.11
= control target key start
LH: loop header
LB: loop body
LE: loop exit
PB: predicated region body
PF: predicated region fallthrough
CT: control target
= control target key end

     0   :  { %v431_v2 = vmov 128.0   ;;  %s655_s0 = inlined_call_operand.vmem [shape: f32[16,128], index: 0, kind: input, shape index: {}]   ;;  %s656_s1 = inlined_call_operand.vmem [shape: f32[1,128], index: 1, kind: input, shape index: {}]   ;;  %s657_s2 = inlined_call_operand.vmem [shape: f32[1,128], index: 2, kind: input, shape index: {}]   ;;  %s658_s3 = inlined_call_operand.vmem [shape: bf16[128,384], index: 3, kind: input, shape index: {}]   ;;  %s659_s4 = inlined_call_operand.vmem [shape: f32[1,384], index: 4, kind: input, shape index: {}]   ;;  %s660_s5 = inlined_call_operand.vmem [shape: f32[16,384], index: 5, kind: output, shape index: {}]  }
   0x1   :  { %v20_v0 = vld [vmem:[%s655_s0] sm:$0xff]  ;;  %v21_v1 = vld [vmem:[%s655_s0 + $0x8] sm:$0xff]  ;;  %425 = vrcp.f32 %v431_v2  ;;  %v420_v18 = vld [vmem:[%s658_s3 + $0xb0] sm:$0xf0] }
   0x2   :  { %24 = vadd.xlane.f32.xlu0 %v20_v0  ;;  %v388_v17 = vld [vmem:[%s658_s3 + $0xa8] sm:$0xf]  ;;  %v419_v19 = vld [vmem:[%s658_s3 + $0xac] sm:$0xf]  ;;  %v390_v21 = vld [vmem:[%s658_s3 + $0xb4] sm:$0xf0] }
   0x3   :  { %v389_v20 = vor.u32 %v420_v18, %v388_v17  ;;  %v396_v22 = vld [vmem:[%s658_s3 + $0xb0] sm:$0xf]  ;;  %v421_v23 = vld [vmem:[%s658_s3 + $0xb8] sm:$0xf0]  ;;  %v393_v24 = vor.u32 %v419_v19, %v390_v21  ;;  %v416_v28 = vld [vmem:[%s658_s3 + $0x94] sm:$0xf] }
   0x4   :  { %v397_v25 = vor.u32 %v421_v23, %v396_v22  ;;  %v376_v26 = vld [vmem:[%s658_s3 + $0x90] sm:$0xf]  ;;  %v417_v27 = vld [vmem:[%s658_s3 + $0x98] sm:$0xf0]  ;;  %v378_v30 = vld [vmem:[%s658_s3 + $0x9c] sm:$0xf0] }
   0x5   :  { %250 = vmatpush.bf16.msra.mxu0 %v389_v20  ;;  %264 = vmatpush.bf16.msra.mxu1 %v393_v24  ;;  %v377_v29 = vor.u32 %v417_v27, %v376_v26  ;;  %v384_v31 = vld [vmem:[%s658_s3 + $0x98] sm:$0xf]  ;;  %v418_v32 = vld [vmem:[%s658_s3 + $0xa0] sm:$0xf0]  ;;  %v381_v33 = vor.u32 %v416_v28, %v378_v30  ;;  %v413_v37 = vld [vmem:[%s658_s3 + $0x7c] sm:$0xf] }
   0x6   :  { %278 = vmatpush.bf16.msra.mxu2 %v397_v25  ;;  %v385_v34 = vor.u32 %v418_v32, %v384_v31  ;;  %v364_v35 = vld [vmem:[%s658_s3 + $0x78] sm:$0xf]  ;;  %v414_v36 = vld [vmem:[%s658_s3 + $0x80] sm:$0xf0]  ;;  %v366_v39 = vld [vmem:[%s658_s3 + $0x84] sm:$0xf0] }
   0x7   :  { %v426_v3 = vpop.eup %425  ;;  %v365_v38 = vor.u32 %v414_v36, %v364_v35  ;;  %v372_v40 = vld [vmem:[%s658_s3 + $0x80] sm:$0xf]  ;;  %v415_v41 = vld [vmem:[%s658_s3 + $0x88] sm:$0xf0]  ;;  %v369_v42 = vor.u32 %v413_v37, %v366_v39  ;;  %v410_v46 = vld [vmem:[%s658_s3 + $0x64] sm:$0xf] }
   0x8   :  { %v29_v4 = vmul.f32 128.0, %v426_v3  ;;  %vm33_vm0 = vweird.f32 %v426_v3  ;;  %v373_v43 = vor.u32 %v415_v41, %v372_v40  ;;  %v352_v44 = vld [vmem:[%s658_s3 + $0x60] sm:$0xf]  ;;  %v411_v45 = vld [vmem:[%s658_s3 + $0x68] sm:$0xf0] }
   0x9   :  { %251 = vmatpush.bf16.msra.mxu0 %v377_v29  ;;  %265 = vmatpush.bf16.msra.mxu1 %v381_v33  ;;  %v353_v47 = vor.u32 %v411_v45, %v352_v44  ;;  %v354_v48 = vld [vmem:[%s658_s3 + $0x6c] sm:$0xf0]  ;;  %v360_v49 = vld [vmem:[%s658_s3 + $0x68] sm:$0xf]  ;;  %v412_v50 = vld [vmem:[%s658_s3 + $0x70] sm:$0xf0] }
   0xa   :  { %26 = vadd.xlane.f32.xlu0 %v21_v1  ;;  %v30_v5 = vsub.f32 1.0, %v29_v4  ;;  %279 = vmatpush.bf16.msra.mxu2 %v385_v34  ;;  %v357_v51 = vor.u32 %v410_v46, %v354_v48  ;;  %v361_v52 = vor.u32 %v412_v50, %v360_v49  ;;  %v340_v53 = vld [vmem:[%s658_s3 + $0x48] sm:$0xf]  ;;  %v408_v54 = vld [vmem:[%s658_s3 + $0x50] sm:$0xf0] }
   0xb   :  { %v407_v55 = vld [vmem:[%s658_s3 + $0x4c] sm:$0xf]  ;;  %v341_v56 = vor.u32 %v408_v54, %v340_v53  ;;  %v342_v57 = vld [vmem:[%s658_s3 + $0x54] sm:$0xf0]  ;;  %v348_v58 = vld [vmem:[%s658_s3 + $0x50] sm:$0xf] }
   0xc   :  { %v31_v6 = vmul.f32 %v426_v3, %v30_v5  ;;  %v409_v59 = vld [vmem:[%s658_s3 + $0x58] sm:$0xf0]  ;;  %v345_v60 = vor.u32 %v407_v55, %v342_v57  ;;  %v328_v62 = vld [vmem:[%s658_s3 + $0x30] sm:$0xf]  ;;  %v330_v2 = vld [vmem:[%s658_s3 + $0x3c] sm:$0xf0] }
   0xd   :  { %252 = vmatpush.bf16.msra.mxu0 %v365_v38  ;;  %266 = vmatpush.bf16.msra.mxu1 %v369_v42  ;;  %v349_v61 = vor.u32 %v409_v59, %v348_v58  ;;  %v405_v63 = vld [vmem:[%s658_s3 + $0x38] sm:$0xf0]  ;;  %v406_v4 = vld [vmem:[%s658_s3 + $0x40] sm:$0xf0]  ;;  %v304_v19 = vld [vmem:[%s658_s3] sm:$0xf] }
   0xe   :  { %v32_v7 = vadd.f32 %v426_v3, %v31_v6  ;;  %280 = vmatpush.bf16.msra.mxu2 %v373_v43  ;;  %v399_v20 = vld [vmem:[%s658_s3 + $0x8] sm:$0xf0]  ;;  %v398_v21 = vld [vmem:[%s658_s3 + $0x4] sm:$0xf]  ;;  %v306_v24 = vld [vmem:[%s658_s3 + $0xc] sm:$0xf0] }
   0xf   :  { %v305_v23 = vor.u32 %v399_v20, %v304_v19  ;;  %v312_v25 = vld [vmem:[%s658_s3 + $0x8] sm:$0xf]  ;;  %v400_v26 = vld [vmem:[%s658_s3 + $0x10] sm:$0xf0]  ;;  %v309_v28 = vor.u32 %v398_v21, %v306_v24  ;;  %v423_v46 = vld [vmem:[%s656_s1] ss:$0 sm:$0xff] }
  0x10   :  { %v468_v8 = vsel %vm33_vm0, %v426_v3, %v32_v7  ;;  %v336_v3 = vld [vmem:[%s658_s3 + $0x38] sm:$0xf]  ;;  %v313_v29 = vor.u32 %v400_v26, %v312_v25 }
  0x11   :  { %253 = vmatpush.bf16.msra.mxu0 %v353_v47  ;;  %267 = vmatpush.bf16.msra.mxu1 %v357_v51  ;;  %v337_v6 = vor.u32 %v406_v4, %v336_v3  ;;  %v316_v7 = vld [vmem:[%s658_s3 + $0x18] sm:$0xf]  ;;  %v424_v51 = vld [vmem:[%s657_s2] ss:$0 sm:$0xff] }
  0x12   :  { %281 = vmatpush.bf16.msra.mxu2 %v361_v52 }
  0x15   :  { %254 = vmatpush.bf16.msra.mxu0 %v341_v56  ;;  %268 = vmatpush.bf16.msra.mxu1 %v345_v60 }
  0x16   :  { %282 = vmatpush.bf16.msra.mxu2 %v349_v61 }
  0x1a   :  { %283 = vmatpush.bf16.msra.mxu2 %v337_v6 }
  0x75   :  { %v25_v9 = vpop.xlane.xlu0 %24 }
  0x76   :  { %v35_v10 = vmul.f32 %v468_v8, %v25_v9  ;;  %v402_v9 = vld [vmem:[%s658_s3 + $0x20] sm:$0xf0] }
  0x78   :  { %v471_v11 = vsub.f32 %v20_v0, %v35_v10  ;;  %v404_v0 = vld [vmem:[%s658_s3 + $0x34] sm:$0xf]  ;;  %v401_v10 = vld [vmem:[%s658_s3 + $0x1c] sm:$0xf] }
  0x79   :  { %v333_v5 = vor.u32 %v404_v0, %v330_v2 }
  0x7a   :  { %v39_v12 = vmul.f32 %v471_v11, %v471_v11 }
  0x7b   :  { %269 = vmatpush.bf16.msra.mxu1 %v333_v5 }
  0x7c   :  { %41 = vadd.xlane.f32.xlu1 %v39_v12  ;;  %v317_v12 = vor.u32 %v402_v9, %v316_v7 }
  0x7d   :  { %v27_v13 = vpop.xlane.xlu0 %26 }
  0x7e   :  { %v36_v14 = vmul.f32 %v468_v8, %v27_v13  ;;  %v318_v13 = vld [vmem:[%s658_s3 + $0x24] sm:$0xf0] }
  0x7f   :  { %v321_v17 = vor.u32 %v401_v10, %v318_v13 }
  0x80   :  { %v476_v15 = vsub.f32 %v21_v1, %v36_v14  ;;  %v329_v1 = vor.u32 %v405_v63, %v328_v62  ;;  %v324_v14 = vld [vmem:[%s658_s3 + $0x20] sm:$0xf] }
  0x81   :  { %270 = vmatpush.bf16.msra.mxu1 %v321_v17 }
  0x82   :  { %v40_v16 = vmul.f32 %v476_v15, %v476_v15  ;;  %255 = vmatpush.bf16.msra.mxu0 %v329_v1 }
  0x84   :  { %43 = vadd.xlane.f32.xlu1 %v40_v16  ;;  %v403_v16 = vld [vmem:[%s658_s3 + $0x28] sm:$0xf0] }
  0x85   :  { %v325_v18 = vor.u32 %v403_v16, %v324_v14  ;;  %271 = vmatpush.bf16.msra.mxu1 %v309_v28 }
  0x86   :  { %256 = vmatpush.bf16.msra.mxu0 %v317_v12 }
  0x87   :  { %284 = vmatpush.bf16.msra.mxu2 %v325_v18 }
  0x8a   :  { %257 = vmatpush.bf16.msra.mxu0 %v305_v23 }
  0x8b   :  { %285 = vmatpush.bf16.msra.mxu2 %v313_v29 }
  0xef   :  { %v42_v22 = vpop.xlane.xlu1 %41 }
  0xf0   :  { %v45_v27 = vmul.f32 %v42_v22, %v468_v8 }
  0xf2   :  { %v47_v30 = vadd.f32 1e-05, %v45_v27 }
  0xf4   :  { %427 = vrsqrt.f32 %v47_v30  ;;  %vm55_vm2 = vweird.f32 %v47_v30 }
  0xf7   :  { %v44_v31 = vpop.xlane.xlu1 %43 }
  0xf8   :  { %v46_v32 = vmul.f32 %v44_v31, %v468_v8 }
  0xfa   :  { %v428_v33 = vpop.eup %427  ;;  %v48_v34 = vadd.f32 1e-05, %v46_v32 }
  0xfb   :  { %v50_v35 = vmul.f32 %v428_v33, %v47_v30  ;;  %vm56_vm1 = vweird.f32 %v428_v33 }
  0xfc   :  { %429 = vrsqrt.f32 %v48_v34  ;;  %vm57_vm3 = vmor %vm55_vm2, %vm56_vm1  ;;  %vm65_vm5 = vweird.f32 %v48_v34 }
  0xfd   :  { %v51_v36 = vmul.f32 %v428_v33, %v50_v35 }
  0xff   :  { %v52_v37 = vmul.f32 0.5, %v51_v36 }
 0x101   :  { %v53_v38 = vsub.f32 1.5, %v52_v37 }
 0x102   :  { %v430_v39 = vpop.eup %429 }
 0x103   :  { %v54_v40 = vmul.f32 %v428_v33, %v53_v38  ;;  %v60_v41 = vmul.f32 %v430_v39, %v48_v34  ;;  %vm66_vm4 = vweird.f32 %v430_v39 }
 0x104   :  { %vm67_vm6 = vmor %vm65_vm5, %vm66_vm4 }
 0x105   :  { %v61_v42 = vmul.f32 %v430_v39, %v60_v41  ;;  %v58_v43 = vsel %vm57_vm3, %v428_v33, %v54_v40 }
 0x106   :  { %v69_v8 = vmul.f32 %v58_v43, %v471_v11  ;;  %v114_v11 = vld [vmem:[%s659_s4] sm:$0x7] }
 0x107   :  { %v62_v44 = vmul.f32 0.5, %v61_v42  ;;  %v116_v56 = vperm.slane %v114_v11, 0  ;;  %v117_v57 = vperm.slane %v114_v11, 1  ;;  %v118_v61 = vperm.slane %v114_v11, 2 }
 0x108   :  { %v74_v50 = vmul.f32 %v423_v46, %v69_v8 }
 0x109   :  { %v63_v45 = vsub.f32 1.5, %v62_v44 }
 0x10a   :  { %v79_v53 = vadd.f32 %v424_v51, %v74_v50 }
 0x10b   :  { %v64_v47 = vmul.f32 %v430_v39, %v63_v45 }
 0x10d   :  { %v68_v48 = vsel %vm67_vm6, %v430_v39, %v64_v47 }
 0x10e   :  { %v70_v49 = vmul.f32 %v68_v48, %v476_v15 }
 0x110   :  { %v75_v52 = vmul.f32 %v423_v46, %v70_v49 }
 0x112   :  { %v80_v54 = vadd.f32 %v424_v51, %v75_v52 }
 0x114   :  { %v81_v55 = vpack.c.bf16 %v80_v54, %v79_v53 }
 0x116   :  { %258 = vmatmul.bf16.vlgmr.msra.gmra.mxu0 %v81_v55  ;;  %272 = vmatmul.bf16.vlgmr.msra.gmra.mxu1 %v81_v55 }
 0x117   :  { %286 = vmatmul.bf16.vlgmr.msra.gmra.mxu2 %v81_v55 }
 0x193   :  { %v259_v58 = vpop.f32.mrf.mxu0  ;;  %v273_v15 = vpop.f32.mrf.mxu1 }
 0x194   :  { %v260_v59 = vadd.f32 %v259_v58, %v116_v56  ;;  %v274_v60 = vadd.f32 %v273_v15, %v117_v57 }
 0x196   :  { %292 = vst [vmem:[%s660_s5] sm:$0xff] %v260_v59 }
 0x197   :  { %293 = vst [vmem:[%s660_s5 + $0x8] sm:$0xff] %v274_v60 }
 0x19a   :  { %v287_v62 = vpop.f32.mrf.mxu2 }
 0x19b   :  { %v288_v63 = vadd.f32 %v287_v62, %v118_v61  ;;  %v261_v0 = vpop.f32.mrf.mxu0  ;;  %v275_v1 = vpop.f32.mrf.mxu1 }
 0x19c   :  { %v262_v2 = vadd.f32 %v261_v0, %v116_v56  ;;  %v276_v3 = vadd.f32 %v275_v1, %v117_v57 }
 0x19d   :  { %294 = vst [vmem:[%s660_s5 + $0x10] sm:$0xff] %v288_v63 }
 0x19e   :  { %295 = vst [vmem:[%s660_s5 + $0x18] sm:$0xff] %v262_v2 }
 0x19f   :  { %296 = vst [vmem:[%s660_s5 + $0x20] sm:$0xff] %v276_v3 }
 0x1a2   :  { %v289_v4 = vpop.f32.mrf.mxu2 }
 0x1a3   :  { %v290_v5 = vadd.f32 %v289_v4, %v118_v61 }
 0x1a5   :  { %297 = vst [vmem:[%s660_s5 + $0x28] sm:$0xff] %v290_v5 }

// kernel: refinement_forward.12
= control target key start
LH: loop header
LB: loop body
LE: loop exit
PB: predicated region body
PF: predicated region fallthrough
CT: control target
= control target key end

     0   :  { %s528_s18 = smov 0   ;;  %s587_s0 = inlined_call_operand.vmem [shape: f32[2,8,384], index: 0, kind: input, shape index: {}]   ;;  %s588_s1 = inlined_call_operand.vmem [shape: f32[8,64], index: 1, kind: input, shape index: {}]   ;;  %s589_s2 = inlined_call_operand.vmem [shape: f32[8,64], index: 2, kind: input, shape index: {}]   ;;  %s590_s3 = inlined_call_operand.vmem [shape: f32[8,64], index: 3, kind: input, shape index: {}]   ;;  %s591_s4 = inlined_call_operand.vmem [shape: f32[8,64], index: 4, kind: input, shape index: {}]   ;;  %s592_s5 = inlined_call_operand.vmem [shape: f32[2,8,128], index: 5, kind: output, shape index: {}]  }
   0x1 LB: > { %s454_s19 = sadd.s32 4294967295, %s493_s18   ;;  %p458_p0 = scmp.ge.s32.totalorder %s493_s18, 1  ;;  %s493_s18 = sphi %s528_s18, %s15_s18  }
   0x2   : > { %p187_p1 = scmp.lt.s32.totalorder %s493_s18, 3 }
   0x4   : > { %p188_p2 = pnand %p458_p0, %p187_p1 }
   0x5   : > { %p214_p3 = scmp.lt.s32.totalorder (!%p188_p2), %s454_s19, 1  ;;  %s495_s24 = smov (!%p188_p2), 96  }
   0x6   : > { %191 = sbr.rel (%p188_p2) target bundleno = 865 (0x361), region = 40  ;;  %s496_s25 = smov (!%p188_p2), 32  }
   0x7   : > { %s497_s30 = smov (!%p188_p2), 64  }
   0xb   : > { %s594_s19 = smov (!%p214_p3, %s454_s19), 1  ;;  %v227_v2 = vld [vmem:[%s588_s1] sm:$0xff]  ;;  %vm239_vm0 = vcmask 261120   ;;  %vm256_vm1 = vcmask 523264   ;;  %vm276_vm2 = vcmask 64512   ;;  %vm292_vm3 = vcmask 1043456  }
   0xc   : > { %s467_s20 = smul.u32 24, %s594_s19  ;;  %v229_v3 = vld [vmem:[%s590_s3] sm:$0xff]  ;;  %s460_s10 = sshll.u32 %s594_s19, 3 }
   0xd   : > { %323 = vrot.lane.b32.xlu2 %v229_v3, %s497_s30  ;;  %v230_v6 = vld [vmem:[%s591_s4] sm:$0xff]  ;;  %s222_s13 = scalar_lea.vmem %s592_s5, %s460_s10 }
   0xe   : > { %s542_s23 = scalar_lea.vmem %s587_s0, %s467_s20  ;;  %v228_v7 = vld [vmem:[%s589_s2] sm:$0xff] }
   0xf   : > { %v225_v0 = vld [vmem:[%s542_s23 + $0x8] sm:$0xff]  ;;  %v224_v1 = vld [vmem:[%s542_s23] sm:$0xff]  ;;  %v226_v41 = vld [vmem:[%s542_s23 + $0x10] sm:$0xff] }
  0x10   : > { %245 = vrot.lane.b32.xlu0 %v225_v0, %s495_s24  ;;  %233 = vrot.lane.b32.xlu1 %v224_v1, %s495_s24  ;;  %v243_v10 = vmul.f32 %v229_v3, %v225_v0  ;;  %v231_v20 = vmul.f32 %v227_v2, %v224_v1  ;;  %v288_v42 = vpack.c.bf16 %v226_v41, %v226_v41 }
  0x12   : > { %v294_v43 = vsel %vm292_vm3, %v288_v42, 0 }
  0x13   : > { %303 = vmatpush.bf16.msra.mxu1 %v294_v43 }
  0x18   : > { %248 = vrot.lane.b32.xlu0 %v225_v0, %s496_s25  ;;  %236 = vrot.lane.b32.xlu1 %v224_v1, %s496_s25 }
  0x20   : > { %311 = vrot.lane.b32.xlu0 %v227_v2, %s497_s30 }
  0x67   : > { %v324_v25 = vpop.permute.xlu2 %323 }
  0x68   : > { %v326_v26 = vmul.f32 %v324_v25, %v225_v0 }
  0x82   : > { %v246_v4 = vpop.permute.xlu0 %245  ;;  %v234_v5 = vpop.permute.xlu1 %233 }
  0x8a   : > { %v249_v8 = vpop.permute.xlu0 %248  ;;  %v237_v9 = vpop.permute.xlu1 %236 }
  0x8b   : > { %v251_v11 = vsel %vm239_vm0, %v246_v4, %v249_v8  ;;  %v327_v12 = vsel %vm239_vm0, %v249_v8, %v246_v4  ;;  %v315_v13 = vsel %vm239_vm0, %v237_v9, %v234_v5  ;;  %v240_v17 = vsel %vm239_vm0, %v234_v5, %v237_v9 }
  0x8c   : > { %v252_v14 = vmul.f32 %v251_v11, %v230_v6  ;;  %v328_v15 = vmul.f32 %v327_v12, %v230_v6  ;;  %v316_v16 = vmul.f32 %v315_v13, %v228_v7  ;;  %v241_v19 = vmul.f32 %v240_v17, %v228_v7 }
  0x8e   : > { %318 = vrot.lane.b32.xlu1 %v316_v16, %s497_s30  ;;  %v253_v18 = vadd.f32 %v252_v14, %v243_v10  ;;  %330 = vrot.lane.b32.xlu2 %v328_v15, %s497_s30  ;;  %v242_v23 = vadd.f32 %v241_v19, %v231_v20 }
  0x90   : > { %v255_v21 = vpack.c.bf16 %v253_v18, %v253_v18  ;;  %v254_v24 = vpack.c.bf16 %v242_v23, %v242_v23 }
  0x92   : > { %v261_v22 = vsel %vm256_vm1, %v255_v21, 0  ;;  %v312_v30 = vpop.permute.xlu0 %311 }
  0x93   : > { %270 = vmatpush.bf16.xpose.msra.mxu0 %v261_v22  ;;  %v314_v31 = vmul.f32 %v312_v30, %v224_v1 }
  0x9a   : > { %461 = vmatmul.msk.bf16.vlgmr.msra.gmra.mxu0 %vm256_vm1, %v254_v24 }
  0xe8   : > { %v331_v27 = vpop.permute.xlu2 %330 }
  0xe9   : > { %v333_v28 = vadd.f32 %v331_v27, %v326_v26 }
  0xeb   : > { %v335_v29 = vpack.c.bf16 %v333_v28, %v333_v28 }
  0xed   : > { %340 = vrot.lane.b32.xlu2 %v335_v29, %s497_s30 }
  0xf5   : > { %373 = vrot.lane.b32.xlu2 %v288_v42, %s497_s30 }
 0x100   : > { %v319_v32 = vpop.permute.xlu1 %318 }
 0x101   : > { %v321_v33 = vadd.f32 %v319_v32, %v314_v31 }
 0x103   : > { %v334_v34 = vpack.c.bf16 %v321_v33, %v321_v33 }
 0x105   : > { %337 = vrot.lane.b32.xlu0 %v334_v34, %s497_s30 }
 0x117   : > { %v272_v35 = vpop.f32.mrf.mxu0 }
 0x118   : > { %v277_v37 = vsel %vm276_vm2, %v272_v35, -inf }
 0x11f   : > { %v274_v36 = vpop.f32.mrf.mxu0 }
 0x12f   : > { %278 = vmax.xlane.f32.xlu0 %v277_v37 }
 0x147   : > { %v341_v38 = vpop.permute.xlu2 %340 }
 0x148   : > { %v346_v39 = vsel %vm256_vm1, %v341_v38, 0 }
 0x149   : > { %355 = vmatpush.bf16.xpose.msra.mxu2 %v346_v39 }
 0x14f   : > { %v374_v55 = vpop.permute.xlu2 %373 }
 0x150   : > { %v379_v56 = vsel %vm292_vm3, %v374_v55, 0 }
 0x151   : > { %388 = vmatpush.bf16.msra.mxu3 %v379_v56 }
 0x177   : > { %v338_v40 = vpop.permute.xlu0 %337 }
 0x178   : > { %463 = vmatmul.msk.bf16.vlgmr.msra.gmra.mxu2 %vm256_vm1, %v338_v40 }
 0x1a2   : > { %v279_v44 = vpop.xlane.xlu0 %278 }
 0x1a3   : > { %v280_v45 = vsub.f32 %v272_v35, %v279_v44 }
 0x1a5   : > { %v281_v46 = vmul.f32 1.442695, %v280_v45 }
 0x1a7   : > { %479 = vpow2.f32 %v281_v46 }
 0x1ad   : > { %v480_v47 = vpop.eup %479 }
 0x1ae   : > { %v287_v48 = vpack.c.bf16 %v480_v47, %v480_v47  ;;  %v283_v52 = vsel %vm276_vm2, %v480_v47, 0.0 }
 0x1b0   : > { %462 = vmatmul.msk.bf16.vlgmr.msra.gmra.mxu1 %vm276_vm2, %v287_v48 }
 0x1fb   : > { %v357_v49 = vpop.f32.mrf.mxu2 }
 0x1fc   : > { %v361_v50 = vsel %vm276_vm2, %v357_v49, -inf }
 0x1fd   : > { %362 = vmax.xlane.f32.xlu1 %v361_v50 }
 0x203   : > { %v359_v51 = vpop.f32.mrf.mxu2 }
 0x205   : > { %284 = vadd.xlane.f32.xlu1 %v283_v52 }
 0x22d   : > { %v305_v53 = vpop.f32.mrf.mxu1 }
 0x235   : > { %v307_v54 = vpop.f32.mrf.mxu1 }
 0x270   : > { %v363_v57 = vpop.xlane.xlu1 %362 }
 0x271   : > { %v364_v58 = vsub.f32 %v357_v49, %v363_v57 }
 0x273   : > { %v365_v59 = vmul.f32 1.442695, %v364_v58 }
 0x275   : > { %481 = vpow2.f32 %v365_v59 }
 0x278   : > { %v285_v4 = vpop.xlane.xlu1 %284 }
 0x27b   : > { %v482_v60 = vpop.eup %481 }
 0x27c   : > { %v367_v61 = vsel %vm276_vm2, %v482_v60, 0.0  ;;  %v371_v62 = vpack.c.bf16 %v482_v60, %v482_v60 }
 0x27d   : > { %368 = vadd.xlane.f32.xlu2 %v367_v61 }
 0x27e   : > { %464 = vmatmul.msk.bf16.vlgmr.msra.gmra.mxu3 %vm276_vm2, %v371_v62 }
 0x2f0   : > { %v369_v63 = vpop.xlane.xlu2 %368 }
 0x2f1   : > { %483 = vrcp.f32 %v369_v63 }
 0x2f2   : > { %485 = vrcp.f32 %v285_v4 }
 0x2f7   : > { %v484_v0 = vpop.eup %483 }
 0x2f8   : > { %v486_v5 = vpop.eup %485 }
 0x2f9   : > { %v309_v6 = vmul.f32 %v486_v5, %v305_v53 }
 0x301   : > { %v390_v1 = vpop.f32.mrf.mxu3 }
 0x302   : > { %v394_v2 = vmul.f32 %v484_v0, %v390_v1 }
 0x304   : > { %396 = vrot.lane.b32.xlu2 %v394_v2, %s497_s30 }
 0x309   : > { %v392_v3 = vpop.f32.mrf.mxu3 }
 0x35e   : > { %v397_v7 = vpop.permute.xlu2 %396 }
 0x35f   : > { %v399_v8 = vsel %vm256_vm1, %v309_v6, %v397_v7 }
 0x360   : > { %400 = vst [vmem:[%s222_s13] sm:$0xff] %v399_v8 }
 0x361 PF: > { %s15_s18 = sadd.s32 1, %s493_s18  }
 0x362   : > { %p12_p4 = scmp.ge.s32.totalorder %s15_s18, 4  }
 0x364   :  { %14 = sbr.rel (!%p12_p4) target bundleno = 1 (0x1), region = 70 }

// kernel: refinement_forward.13
= control target key start
LH: loop header
LB: loop body
LE: loop exit
PB: predicated region body
PF: predicated region fallthrough
CT: control target
= control target key end

     0   :  { %s223_s2 = inlined_call_operand.vmem [shape: bf16[128,128], index: 2, kind: input, shape index: {}]   ;;  %s224_s3 = inlined_call_operand.vmem [shape: f32[1,128], index: 3, kind: input, shape index: {}]   ;;  %s225_s0 = inlined_call_operand.vmem [shape: f32[16,128], index: 0, kind: input, shape index: {}]   ;;  %s226_s1 = inlined_call_operand.vmem [shape: f32[16,128], index: 1, kind: input, shape index: {}]   ;;  %s227_s4 = inlined_call_operand.vmem [shape: f32[16,128], index: 4, kind: output, shape index: {}]  }
   0x1   :  { %v151_v0 = vld [vmem:[%s223_s2 + $0x38] sm:$0xff]  ;;  %v150_v1 = vld [vmem:[%s223_s2 + $0x30] sm:$0xff]  ;;  %v149_v2 = vld [vmem:[%s223_s2 + $0x28] sm:$0xff] }
   0x2   :  { %88 = vmatpush.bf16.msra.mxu0 %v151_v0  ;;  %v148_v3 = vld [vmem:[%s223_s2 + $0x20] sm:$0xff]  ;;  %v147_v4 = vld [vmem:[%s223_s2 + $0x18] sm:$0xff]  ;;  %v146_v5 = vld [vmem:[%s223_s2 + $0x10] sm:$0xff] }
   0x3   :  { %v145_v6 = vld [vmem:[%s223_s2 + $0x8] sm:$0xff]  ;;  %v144_v7 = vld [vmem:[%s223_s2] sm:$0xff] }
   0x4   :  { %v17_v8 = vld [vmem:[%s225_s0] sm:$0xff]  ;;  %v18_v9 = vld [vmem:[%s225_s0 + $0x8] sm:$0xff] }
   0x5   :  { %v19_v10 = vpack.c.bf16 %v18_v9, %v17_v8  ;;  %v152_v11 = vld [vmem:[%s224_s3] ss:$0 sm:$0xff]  ;;  %v103_v17 = vld [vmem:[%s226_s1 + $0x8] sm:$0xff] }
   0x6   :  { %89 = vmatpush.bf16.msra.mxu0 %v150_v1  ;;  %v102_v13 = vld [vmem:[%s226_s1] sm:$0xff] }
   0xa   :  { %90 = vmatpush.bf16.msra.mxu0 %v149_v2 }
   0xe   :  { %91 = vmatpush.bf16.msra.mxu0 %v148_v3 }
  0x12   :  { %92 = vmatpush.bf16.msra.mxu0 %v147_v4 }
  0x16   :  { %93 = vmatpush.bf16.msra.mxu0 %v146_v5 }
  0x1a   :  { %94 = vmatpush.bf16.msra.mxu0 %v145_v6 }
  0x1e   :  { %95 = vmatpush.bf16.msra.mxu0 %v144_v7 }
  0x21   :  { %96 = vmatmul.bf16.vlgmr.msra.gmra.mxu0 %v19_v10 }
  0x9e   :  { %v97_v12 = vpop.f32.mrf.mxu0 }
  0x9f   :  { %v98_v14 = vadd.f32 %v152_v11, %v97_v12 }
  0xa1   :  { %v104_v15 = vadd.f32 %v102_v13, %v98_v14 }
  0xa3   :  { %106 = vst [vmem:[%s227_s4] sm:$0xff] %v104_v15 }
  0xa6   :  { %v99_v16 = vpop.f32.mrf.mxu0 }
  0xa7   :  { %v100_v18 = vadd.f32 %v152_v11, %v99_v16 }
  0xa9   :  { %v105_v19 = vadd.f32 %v103_v17, %v100_v18 }
  0xab   :  { %107 = vst [vmem:[%s227_s4 + $0x8] sm:$0xff] %v105_v19 }

// kernel: refinement_forward.19
= control target key start
LH: loop header
LB: loop body
LE: loop exit
PB: predicated region body
PF: predicated region fallthrough
CT: control target
= control target key end

     0   :  { %10 = vsyncpa [#allocation3], 0  ;;  %s730_s0 = inlined_call_operand.vmem [shape: f32[2,8,128], index: 0, kind: input, shape index: {}]   ;;  %s731_s1 = inlined_call_operand.vmem [shape: f32[1,128], index: 1, kind: input, shape index: {}]   ;;  %s732_s2 = inlined_call_operand.vmem [shape: f32[1,128], index: 2, kind: input, shape index: {}]   ;;  %s733_s3 = inlined_call_operand.vmem [shape: bf16[128,8], index: 3, kind: input, shape index: {}]   ;;  %s734_s4 = inlined_call_operand.vmem [shape: f32[1,8], index: 4, kind: input, shape index: {}]   ;;  %s735_s5 = inlined_call_operand.hbm [shape: f32[2,1,8], index: 5, kind: output, shape index: {}]  }
   0x1   :  { %12 = vsyncpa [#allocation3 + $0x1], 0  ;;  %s612_s18 = smov 0   ;;  %s614_s19 = smov 0  }
   0x2   :  { %s616_s20 = smov 0   ;;  %s618_s21 = smov 0  }
   0x3 LB: > { %s633_s22 = sadd.s32 4294967295, %s578_s21   ;;  %s420_s23 = sadd.s32 4294967294, %s578_s21   ;;  %s578_s21 = sphi %s618_s21, %s741_s21   ;;  %s574_s20 = sphi %s616_s20, %s740_s20   ;;  %s570_s19 = sphi %s614_s19, %s739_s19   ;;  %s566_s18 = sphi %s612_s18, %s738_s18  }
   0x4   : > { %s637_s24 = sadd.s32 1, %s578_s21   ;;  %s135_s25 = sadd.s32 1, %s574_s20 }
   0x5   : > { %s132_s26 = ssub.s32 %s578_s21, %s637_s24  ;;  %p145_p0 = scmp.ne.s32.totalorder %s574_s20, %s570_s19 }
   0x6   : > { %p133_p1 = scmp.eq.s32.totalorder %s132_s26, 0  ;;  %p146_p2 = scmp.eq.s32.totalorder %s633_s22, 1 }
   0x7   : > { %p151_p3 = scmp.ne.s32.totalorder %s570_s19, %s566_s18  ;;  %p152_p4 = scmp.eq.s32.totalorder %s420_s23, 1 }
   0x8   : > { %s648_s27 = scalar_select %p133_p1, %s574_s20, %s135_s25  }
   0x9   : > { %p650_p5 = por %p146_p2, %p145_p0  ;;  %p654_p6 = por %p152_p4, %p151_p3 }
   0xa   : > { %p423_p7 = scmp.ge.s32.totalorder %s578_s21, 1  ;;  %p189_p8 = scmp.lt.s32.totalorder %s578_s21, 3 }
   0xc   : > { %p190_p9 = pnand %p423_p7, %p189_p8 }
   0xd   : > { %p215_p10 = scmp.lt.s32.totalorder (!%p190_p9), %s633_s22, 1  ;;  %s213_s14 = sand.u32 (!%p190_p9), 1, %s570_s19  }
   0xe   : > { %193 = sbr.rel (%p190_p9) target bundleno = 440 (0x1b8), region = 40  ;;  %s361_s17 = scalar_lea.hbm (!%p190_p9), %s735_s5, %s633_s22 }
   0xf   : > { %s214_s26 = scalar_lea.vmem (!%p190_p9), [#allocation2], %s213_s14  ;;  %s353_s7 = scalar_lea.sflag (!%p190_p9), [#allocation3], %s213_s14 }
  0x10   : > { %s536_s11 = scalar_lea.hbm (!%p190_p9), %s735_s5, 2 }
  0x13   : > { %s216_s30 = scalar_select %p215_p10, %s633_s22, 1  ;;  %v580_v1 = vmov 128.0   ;;  %v466_v12 = vld [vmem:[%s733_s3 + $0x38] sm:$0xff]  ;;  %v465_v13 = vld [vmem:[%s733_s3 + $0x30] sm:$0xff]  ;;  %v464_v14 = vld [vmem:[%s733_s3 + $0x28] sm:$0xff]  ;;  %v581_v25 = vmov 8.0  }
  0x14   : > { %510 = vrcp.f32 %v580_v1  ;;  %337 = vmatpush.bf16.msra.mxu0 %v466_v12  ;;  %v463_v15 = vld [vmem:[%s733_s3 + $0x20] sm:$0xff]  ;;  %v462_v16 = vld [vmem:[%s733_s3 + $0x18] sm:$0xff]  ;;  %v461_v17 = vld [vmem:[%s733_s3 + $0x10] sm:$0xff]  ;;  %vm350_vm5 = vcmask 57344  }
  0x15   : > { %s424_s6 = sshll.u32 %s216_s30, 3  ;;  %v460_v20 = vld [vmem:[%s733_s3 + $0x8] sm:$0xff]  ;;  %v459_v22 = vld [vmem:[%s733_s3] sm:$0xff]  ;;  %s363_s30 = sshll.u32 %s214_s26, 4  ;;  %s364_s30 = int_to_ptr.vmem [resolvable:$true] %s363_s30 }
  0x16   : > { %s218_s9 = scalar_lea.vmem %s730_s0, %s424_s6  ;;  %v508_v31 = vld [vmem:[%s731_s1] ss:$0 sm:$0xff]  ;;  %s365_s6 = sshll.u32 %s361_s17, 4  ;;  %s366_s6 = int_to_ptr.hbm [resolvable:$true] %s365_s6 }
  0x17   : > { %v219_v0 = vld [vmem:[%s218_s9] sm:$0xff]  ;;  %s530_s8 = sshra.s32 %s366_s6, 4  ;;  %s531_s8 = int_to_ptr.hbm [resolvable:$true] %s530_s8 }
  0x18   : > { %222 = vadd.xlane.f32.xlu0 %v219_v0  ;;  %338 = vmatpush.bf16.msra.mxu0 %v465_v13  ;;  %v509_v35 = vld [vmem:[%s732_s2] ss:$0 sm:$0xff]  ;;  %s532_s9 = scalar_lea.hbm %s531_s8, 1  ;;  %p537_p0 = scmp.lt.s32.totalorder %s531_s8, %s735_s5 }
  0x19   : > { %v288_v50 = vld [vmem:[%s734_s4] sm:$0x1]  ;;  %p533_p11 = scmp.ne.s32.totalorder %s531_s8, %s532_s9  ;;  %p538_p1 = scmp.lt.s32.totalorder %s536_s11, %s532_s9 }
  0x1a   : > { %v511_v2 = vpop.eup %510 }
  0x1b   : > { %v225_v3 = vmul.f32 128.0, %v511_v2  ;;  %vm229_vm0 = vweird.f32 %v511_v2  ;;  %p534_p12 = pnand %p533_p11, %p650_p5  ;;  %p539_p2 = por %p538_p1, %p537_p0 }
  0x1c   : > { %339 = vmatpush.bf16.msra.mxu0 %v464_v14 }
  0x1d   : > { %v226_v4 = vsub.f32 1.0, %v225_v3  ;;  %p535_p13 = pneg %p534_p12 }
  0x1f   : > { %v227_v5 = vmul.f32 %v511_v2, %v226_v4  ;;  %p540_p3 = pnand %p539_p2, %p535_p13 }
  0x20   : > { %340 = vmatpush.bf16.msra.mxu0 %v463_v15 }
  0x21   : > { %v228_v6 = vadd.f32 %v511_v2, %v227_v5 }
  0x23   : > { %v230_v7 = vsel %vm229_vm0, %v511_v2, %v228_v6 }
  0x24   : > { %341 = vmatpush.bf16.msra.mxu0 %v462_v16 }
  0x28   : > { %342 = vmatpush.bf16.msra.mxu0 %v461_v17 }
  0x2c   : > { %343 = vmatpush.bf16.msra.mxu0 %v460_v20 }
  0x30   : > { %344 = vmatpush.bf16.msra.mxu0 %v459_v22 }
  0x8b   : > { %v223_v8 = vpop.xlane.xlu0 %222 }
  0x8c   : > { %v231_v9 = vmul.f32 %v230_v7, %v223_v8 }
  0x8e   : > { %v232_v10 = vsub.f32 %v219_v0, %v231_v9 }
  0x90   : > { %v233_v11 = vmul.f32 %v232_v10, %v232_v10 }
  0x92   : > { %234 = vadd.xlane.f32.xlu0 %v233_v11 }
 0x105   : > { %v235_v18 = vpop.xlane.xlu0 %234 }
 0x106   : > { %v236_v19 = vmul.f32 %v235_v18, %v230_v7 }
 0x108   : > { %v237_v21 = vadd.f32 1e-05, %v236_v19 }
 0x10a   : > { %512 = vrsqrt.f32 %v237_v21  ;;  %vm244_vm2 = vweird.f32 %v237_v21 }
 0x10b   : > { %514 = vrcp.f32 %v581_v25 }
 0x110   : > { %v513_v23 = vpop.eup %512 }
 0x111   : > { %v239_v24 = vmul.f32 %v513_v23, %v237_v21  ;;  %vm245_vm1 = vweird.f32 %v513_v23  ;;  %v515_v29 = vpop.eup %514 }
 0x112   : > { %vm246_vm3 = vmor %vm244_vm2, %vm245_vm1  ;;  %v264_v33 = vmul.f32 8.0, %v515_v29  ;;  %vm268_vm4 = vweird.f32 %v515_v29 }
 0x113   : > { %v240_v26 = vmul.f32 %v513_v23, %v239_v24 }
 0x114   : > { %v265_v37 = vsub.f32 1.0, %v264_v33 }
 0x115   : > { %v241_v27 = vmul.f32 0.5, %v240_v26 }
 0x116   : > { %v266_v40 = vmul.f32 %v515_v29, %v265_v37 }
 0x117   : > { %v242_v28 = vsub.f32 1.5, %v241_v27 }
 0x118   : > { %v267_v43 = vadd.f32 %v515_v29, %v266_v40 }
 0x119   : > { %v243_v30 = vmul.f32 %v513_v23, %v242_v28 }
 0x11a   : > { %v269_v46 = vsel %vm268_vm4, %v515_v29, %v267_v43 }
 0x11b   : > { %v247_v32 = vsel %vm246_vm3, %v513_v23, %v243_v30 }
 0x11c   : > { %v248_v34 = vmul.f32 %v247_v32, %v232_v10 }
 0x11e   : > { %v252_v36 = vmul.f32 %v508_v31, %v248_v34 }
 0x120   : > { %v256_v38 = vadd.f32 %v509_v35, %v252_v36 }
 0x122   : > { %v257_v39 = vrot.slane %v256_v38, 4 }
 0x124   : > { %v258_v41 = vadd.f32 %v257_v39, %v256_v38 }
 0x126   : > { %v259_v42 = vrot.slane %v258_v41, 2 }
 0x128   : > { %v260_v44 = vadd.f32 %v259_v42, %v258_v41 }
 0x12a   : > { %v261_v45 = vrot.slane %v260_v44, 1 }
 0x12c   : > { %v262_v47 = vadd.f32 %v261_v45, %v260_v44 }
 0x12e   : > { %v270_v48 = vmul.f32 %v269_v46, %v262_v47 }
 0x130   : > { %v271_v49 = vpack.c.bf16 %v270_v48, %v270_v48 }
 0x132   : > { %345 = vmatmul.bf16.vlgmr.msra.gmra.mxu0 %v271_v49 }
 0x1af   : > { %v346_v51 = vpop.f32.mrf.mxu0 }
 0x1b0   : > { %v347_v52 = vadd.f32 %v346_v51, %v288_v50 }
 0x1b2   : > { %351 = vst.msk [vmem:[%s214_s26] sm:$0x1] %vm350_vm5, %v347_v52 }
 0x1b3   : > { %543 = shalt.err (!%p540_p3)
}
 0x1b4   : > { %467 = dma.vmem_to_hbm [thread:$0]  (%p650_p5), %s364_s30, 16, %s366_s6, %s353_s7  }
 0x1b7   : > { %v348_v53 = vpop.f32.mrf.mxu0 }
 0x1b8 PF: > { %p473_p4 = scmp.ge.s32.totalorder %s578_s21, 2  ;;  %s377_s14 = sand.u32 1, %s566_s18  }
 0x1b9   : > { %s378_s15 = scalar_lea.sflag [#allocation3], %s377_s14 }
 0x1ba   : > { %p470_p7 = pnand %p473_p4, %p654_p6 }
 0x1bc   : > { %p471_p8 = pneg %p470_p7 }
 0x1be   : > { %561 = dma.done.wait (%p471_p8), %s378_s15, 16  }
 0x1bf   : > { %563 = vsyncadd (%p471_p8), %s378_s15, 4294967280  ;;  %p15_p9 = scmp.ge.s32.totalorder %s637_s24, 4   ;;  %s738_s18 = smov %s570_s19 }
 0x1c0   : > { %s739_s19 = smov %s574_s20  ;;  %s740_s20 = smov %s648_s27 }
 0x1c1   : > { %s741_s21 = smov %s637_s24  ;;  %17 = sbr.rel (!%p15_p9) target bundleno = 3 (0x3), region = 75 }
 0x1c6   :  { %383 = vsyncpa [#allocation3], 1 }
 0x1c7   :  { %385 = vsyncpa [#allocation3 + $0x1], 1 }

// kernel: refinement_forward.14
= control target key start
LH: loop header
LB: loop body
LE: loop exit
PB: predicated region body
PF: predicated region fallthrough
CT: control target
= control target key end

     0   :  { %v446_v2 = vmov 128.0   ;;  %s587_s0 = inlined_call_operand.vmem [shape: f32[16,128], index: 0, kind: input, shape index: {}]   ;;  %s588_s1 = inlined_call_operand.vmem [shape: f32[1,128], index: 1, kind: input, shape index: {}]   ;;  %s589_s2 = inlined_call_operand.vmem [shape: f32[1,128], index: 2, kind: input, shape index: {}]   ;;  %s590_s4 = inlined_call_operand.vmem [shape: f32[1,128], index: 4, kind: input, shape index: {}]   ;;  %s591_s3 = inlined_call_operand.vmem [shape: bf16[128,128], index: 3, kind: input, shape index: {}]   ;;  %s592_s6 = inlined_call_operand.vmem [shape: f32[1,128], index: 6, kind: input, shape index: {}]   ;;  %s593_s5 = inlined_call_operand.vmem [shape: bf16[128,128], index: 5, kind: input, shape index: {}]   ;;  %s594_s7 = inlined_call_operand.vmem [shape: f32[16,128], index: 7, kind: output, shape index: {}]  }
   0x1   :  { %v490_v0 = vld [vmem:[%s587_s0] sm:$0xff]  ;;  %v496_v1 = vld [vmem:[%s587_s0 + $0x8] sm:$0xff]  ;;  %436 = vrcp.f32 %v446_v2  ;;  %v422_v17 = vld [vmem:[%s591_s3 + $0x38] sm:$0xff] }
   0x2   :  { %30 = vadd.xlane.f32.xlu0 %v490_v0  ;;  %156 = vmatpush.bf16.msra.mxu0 %v422_v17  ;;  %v421_v18 = vld [vmem:[%s591_s3 + $0x30] sm:$0xff]  ;;  %v420_v19 = vld [vmem:[%s591_s3 + $0x28] sm:$0xff]  ;;  %v419_v20 = vld [vmem:[%s591_s3 + $0x20] sm:$0xff] }
   0x3   :  { %v418_v21 = vld [vmem:[%s591_s3 + $0x18] sm:$0xff]  ;;  %v417_v22 = vld [vmem:[%s591_s3 + $0x10] sm:$0xff]  ;;  %v416_v23 = vld [vmem:[%s591_s3 + $0x8] sm:$0xff] }
   0x4   :  { %v415_v25 = vld [vmem:[%s591_s3] sm:$0xff]  ;;  %v430_v55 = vld [vmem:[%s593_s5 + $0x38] sm:$0xff]  ;;  %v429_v59 = vld [vmem:[%s593_s5 + $0x30] sm:$0xff] }
   0x5   :  { %v432_v44 = vld [vmem:[%s588_s1] ss:$0 sm:$0xff]  ;;  %327 = vmatpush.bf16.msra.mxu1 %v430_v55  ;;  %v428_v61 = vld [vmem:[%s593_s5 + $0x28] sm:$0xff] }
   0x6   :  { %157 = vmatpush.bf16.msra.mxu0 %v421_v18  ;;  %v433_v49 = vld [vmem:[%s589_s2] ss:$0 sm:$0xff] }
   0x7   :  { %v437_v3 = vpop.eup %436  ;;  %v434_v54 = vld [vmem:[%s590_s4] ss:$0 sm:$0xff] }
   0x8   :  { %v35_v4 = vmul.f32 128.0, %v437_v3  ;;  %vm39_vm0 = vweird.f32 %v437_v3 }
   0x9   :  { %328 = vmatpush.bf16.msra.mxu1 %v429_v59 }
   0xa   :  { %32 = vadd.xlane.f32.xlu0 %v496_v1  ;;  %v36_v5 = vsub.f32 1.0, %v35_v4  ;;  %158 = vmatpush.bf16.msra.mxu0 %v420_v19  ;;  %v427_v4 = vld [vmem:[%s593_s5 + $0x20] sm:$0xff] }
   0xc   :  { %v37_v6 = vmul.f32 %v437_v3, %v36_v5 }
   0xd   :  { %329 = vmatpush.bf16.msra.mxu1 %v428_v61 }
   0xe   :  { %v38_v7 = vadd.f32 %v437_v3, %v37_v6  ;;  %159 = vmatpush.bf16.msra.mxu0 %v419_v20 }
  0x10   :  { %v40_v8 = vsel %vm39_vm0, %v437_v3, %v38_v7 }
  0x11   :  { %330 = vmatpush.bf16.msra.mxu1 %v427_v4 }
  0x12   :  { %160 = vmatpush.bf16.msra.mxu0 %v418_v21 }
  0x16   :  { %161 = vmatpush.bf16.msra.mxu0 %v417_v22 }
  0x1a   :  { %162 = vmatpush.bf16.msra.mxu0 %v416_v23 }
  0x1e   :  { %163 = vmatpush.bf16.msra.mxu0 %v415_v25 }
  0x75   :  { %v31_v9 = vpop.xlane.xlu0 %30 }
  0x76   :  { %v41_v10 = vmul.f32 %v40_v8, %v31_v9 }
  0x78   :  { %v43_v11 = vsub.f32 %v490_v0, %v41_v10  ;;  %v426_v10 = vld [vmem:[%s593_s5 + $0x18] sm:$0xff] }
  0x79   :  { %331 = vmatpush.bf16.msra.mxu1 %v426_v10 }
  0x7a   :  { %v45_v12 = vmul.f32 %v43_v11, %v43_v11 }
  0x7c   :  { %47 = vadd.xlane.f32.xlu1 %v45_v12 }
  0x7d   :  { %v33_v13 = vpop.xlane.xlu0 %32 }
  0x7e   :  { %v42_v14 = vmul.f32 %v40_v8, %v33_v13 }
  0x80   :  { %v44_v15 = vsub.f32 %v496_v1, %v42_v14 }
  0x82   :  { %v46_v16 = vmul.f32 %v44_v15, %v44_v15 }
  0x84   :  { %49 = vadd.xlane.f32.xlu1 %v46_v16  ;;  %v425_v16 = vld [vmem:[%s593_s5 + $0x10] sm:$0xff] }
  0x85   :  { %332 = vmatpush.bf16.msra.mxu1 %v425_v16 }
  0xef   :  { %v48_v24 = vpop.xlane.xlu1 %47 }
  0xf0   :  { %v51_v26 = vmul.f32 %v48_v24, %v40_v8  ;;  %v424_v24 = vld [vmem:[%s593_s5 + $0x8] sm:$0xff] }
  0xf1   :  { %333 = vmatpush.bf16.msra.mxu1 %v424_v24 }
  0xf2   :  { %v53_v27 = vadd.f32 1e-05, %v51_v26 }
  0xf4   :  { %438 = vrsqrt.f32 %v53_v27  ;;  %vm61_vm2 = vweird.f32 %v53_v27 }
  0xf7   :  { %v50_v28 = vpop.xlane.xlu1 %49 }
  0xf8   :  { %v52_v29 = vmul.f32 %v50_v28, %v40_v8 }
  0xfa   :  { %v439_v30 = vpop.eup %438  ;;  %v54_v31 = vadd.f32 1e-05, %v52_v29 }
  0xfb   :  { %v56_v32 = vmul.f32 %v439_v30, %v53_v27  ;;  %vm62_vm1 = vweird.f32 %v439_v30 }
  0xfc   :  { %440 = vrsqrt.f32 %v54_v31  ;;  %vm63_vm3 = vmor %vm61_vm2, %vm62_vm1  ;;  %vm71_vm5 = vweird.f32 %v54_v31 }
  0xfd   :  { %v57_v33 = vmul.f32 %v439_v30, %v56_v32 }
  0xff   :  { %v58_v34 = vmul.f32 0.5, %v57_v33 }
 0x101   :  { %v59_v35 = vsub.f32 1.5, %v58_v34 }
 0x102   :  { %v441_v36 = vpop.eup %440 }
 0x103   :  { %v60_v37 = vmul.f32 %v439_v30, %v59_v35  ;;  %v66_v38 = vmul.f32 %v441_v36, %v54_v31  ;;  %vm72_vm4 = vweird.f32 %v441_v36  ;;  %v423_v31 = vld [vmem:[%s593_s5] sm:$0xff] }
 0x104   :  { %vm73_vm6 = vmor %vm71_vm5, %vm72_vm4  ;;  %334 = vmatpush.bf16.msra.mxu1 %v423_v31 }
 0x105   :  { %v67_v39 = vmul.f32 %v441_v36, %v66_v38  ;;  %v64_v41 = vsel %vm63_vm3, %v439_v30, %v60_v37 }
 0x106   :  { %v75_v43 = vmul.f32 %v64_v41, %v43_v11 }
 0x107   :  { %v68_v40 = vmul.f32 0.5, %v67_v39 }
 0x108   :  { %v80_v48 = vmul.f32 %v432_v44, %v75_v43 }
 0x109   :  { %v69_v42 = vsub.f32 1.5, %v68_v40 }
 0x10a   :  { %v85_v51 = vadd.f32 %v433_v49, %v80_v48 }
 0x10b   :  { %v70_v45 = vmul.f32 %v441_v36, %v69_v42 }
 0x10d   :  { %v74_v46 = vsel %vm73_vm6, %v441_v36, %v70_v45 }
 0x10e   :  { %v76_v47 = vmul.f32 %v74_v46, %v44_v15 }
 0x110   :  { %v81_v50 = vmul.f32 %v432_v44, %v76_v47 }
 0x112   :  { %v86_v52 = vadd.f32 %v433_v49, %v81_v50 }
 0x114   :  { %v87_v53 = vpack.c.bf16 %v86_v52, %v85_v51 }
 0x116   :  { %164 = vmatmul.bf16.vlgmr.msra.gmra.mxu0 %v87_v53 }
 0x193   :  { %v165_v56 = vpop.f32.mrf.mxu0 }
 0x194   :  { %v537_v57 = vadd.f32 %v434_v54, %v165_v56 }
 0x196   :  { %v540_v58 = vmul.f32 0.70710677, %v537_v57 }
 0x198   :  { %v174_v60 = vmul.f32 %v540_v58, %v540_v58 }
 0x19a   :  { %v175_v62 = vmin.f32 %v174_v60, 16.0 }
 0x19b   :  { %v167_v63 = vpop.f32.mrf.mxu0 }
 0x19c   :  { %v176_v2 = vmul.f32 2.1237322e-06, %v175_v62  ;;  %v550_v3 = vadd.f32 %v434_v54, %v167_v63  ;;  %v187_v5 = vmul.f32 3.8918573e-05, %v175_v62 }
 0x19e   :  { %v177_v6 = vadd.f32 0.00028619796, %v176_v2  ;;  %v556_v7 = vmul.f32 0.70710677, %v550_v3  ;;  %v188_v8 = vadd.f32 0.001143296, %v187_v5 }
 0x1a0   :  { %v214_v9 = vmul.f32 %v556_v7, %v556_v7  ;;  %v178_v11 = vmul.f32 %v177_v6, %v175_v62  ;;  %v189_v12 = vmul.f32 %v188_v8, %v175_v62 }
 0x1a2   :  { %v215_v13 = vmin.f32 %v214_v9, 16.0  ;;  %v190_v14 = vadd.f32 0.014752088, %v189_v12  ;;  %v179_v18 = vadd.f32 0.0036580483, %v178_v11 }
 0x1a4   :  { %v216_v15 = vmul.f32 2.1237322e-06, %v215_v13  ;;  %v227_v17 = vmul.f32 3.8918573e-05, %v215_v13  ;;  %v191_v19 = vmul.f32 %v190_v14, %v175_v62  ;;  %v180_v26 = vmul.f32 %v179_v18, %v175_v62 }
 0x1a6   :  { %v217_v20 = vadd.f32 0.00028619796, %v216_v15  ;;  %v228_v21 = vadd.f32 0.001143296, %v227_v17  ;;  %v192_v22 = vadd.f32 0.112945676, %v191_v19 }
 0x1a7   :  { %v181_v33 = vadd.f32 0.05243302, %v180_v26  ;;  %v170_v19 = vmul.f32 0.5, %v537_v57 }
 0x1a8   :  { %v218_v23 = vmul.f32 %v217_v20, %v215_v13  ;;  %v229_v25 = vmul.f32 %v228_v21, %v215_v13  ;;  %v193_v27 = vmul.f32 %v192_v22, %v175_v62  ;;  %v171_v20 = vmul.f32 0.5, %v550_v3 }
 0x1a9   :  { %v182_v39 = vmul.f32 %v181_v33, %v175_v62 }
 0x1aa   :  { %v219_v28 = vadd.f32 0.0036580483, %v218_v23  ;;  %v230_v29 = vadd.f32 0.014752088, %v229_v25  ;;  %v194_v30 = vadd.f32 0.4994258, %v193_v27 }
 0x1ab   :  { %v183_v43 = vadd.f32 0.18741608, %v182_v39 }
 0x1ac   :  { %v231_v32 = vmul.f32 %v230_v29, %v215_v13  ;;  %v195_v34 = vmul.f32 %v194_v30, %v175_v62  ;;  %v220_v35 = vmul.f32 %v219_v28, %v215_v13 }
 0x1ad   :  { %v184_v48 = vmul.f32 %v183_v43, %v175_v62 }
 0x1ae   :  { %v232_v36 = vadd.f32 0.112945676, %v231_v32  ;;  %v196_v37 = vadd.f32 1.0, %v195_v34  ;;  %v221_v40 = vadd.f32 0.05243302, %v220_v35 }
 0x1af   :  { %v185_v54 = vadd.f32 1.1283791, %v184_v48 }
 0x1b0   :  { %v233_v38 = vmul.f32 %v232_v36, %v215_v13  ;;  %442 = vrcp.f32 %v196_v37  ;;  %v222_v44 = vmul.f32 %v221_v40, %v215_v13  ;;  %v208_v51 = vand.u32 2147483648, %v196_v37 }
 0x1b1   :  { %v206_v53 = vand.u32 2147483647, %v196_v37  ;;  %vm202_vm8 = vweird.f32 %v196_v37  ;;  %v186_v2 = vmul.f32 %v185_v54, %v540_v58 }
 0x1b2   :  { %v234_v41 = vadd.f32 0.4994258, %v233_v38  ;;  %v223_v49 = vadd.f32 0.18741608, %v222_v44  ;;  %v209_v60 = vor.u32 1.1754944e-38, %v208_v51 }
 0x1b3   :  { %vm207_vm10 = vcmp.eq.f32.partialorder %v206_v53, 8.507059e+37 }
 0x1b4   :  { %v235_v42 = vmul.f32 %v234_v41, %v215_v13  ;;  %v224_v56 = vmul.f32 %v223_v49, %v215_v13 }
 0x1b6   :  { %v236_v45 = vadd.f32 1.0, %v235_v42  ;;  %v443_v46 = vpop.eup %442  ;;  %v225_v5 = vadd.f32 1.1283791, %v224_v56 }
 0x1b7   :  { %v198_v47 = vmul.f32 %v443_v46, %v196_v37  ;;  %vm203_vm7 = vweird.f32 %v443_v46 }
 0x1b8   :  { %444 = vrcp.f32 %v236_v45  ;;  %vm204_vm9 = vmor %vm202_vm8, %vm203_vm7  ;;  %v248_v6 = vand.u32 2147483648, %v236_v45  ;;  %v246_v10 = vand.u32 2147483647, %v236_v45  ;;  %vm242_vm12 = vweird.f32 %v236_v45 }
 0x1b9   :  { %v199_v50 = vsub.f32 1.0, %v198_v47  ;;  %v226_v13 = vmul.f32 %v225_v5, %v556_v7  ;;  %v435_v7 = vld [vmem:[%s592_s6] ss:$0 sm:$0xff] }
 0x1ba   :  { %v249_v12 = vor.u32 1.1754944e-38, %v248_v6  ;;  %vm247_vm14 = vcmp.eq.f32.partialorder %v246_v10, 8.507059e+37 }
 0x1bb   :  { %v200_v52 = vmul.f32 %v443_v46, %v199_v50 }
 0x1bd   :  { %v201_v59 = vadd.f32 %v443_v46, %v200_v52 }
 0x1be   :  { %v445_v55 = vpop.eup %444 }
 0x1bf   :  { %v238_v61 = vmul.f32 %v445_v55, %v236_v45  ;;  %v205_v63 = vsel %vm204_vm9, %v443_v46, %v201_v59  ;;  %vm243_vm11 = vweird.f32 %v445_v55 }
 0x1c0   :  { %v210_v4 = vsel %vm207_vm10, %v209_v60, %v205_v63  ;;  %vm244_vm13 = vmor %vm242_vm12, %vm243_vm11 }
 0x1c1   :  { %v239_v62 = vsub.f32 1.0, %v238_v61  ;;  %v211_v8 = vmul.f32 %v210_v4, %v186_v2 }
 0x1c3   :  { %v240_v9 = vmul.f32 %v445_v55, %v239_v62  ;;  %v381_v14 = vclamps-f32 %v211_v8, 1.0 }
 0x1c5   :  { %v241_v11 = vadd.f32 %v445_v55, %v240_v9  ;;  %v254_v18 = vadd.f32 1.0, %v381_v14 }
 0x1c7   :  { %v245_v15 = vsel %vm244_vm13, %v445_v55, %v241_v11  ;;  %v256_v22 = vmul.f32 %v254_v18, %v170_v19 }
 0x1c8   :  { %v250_v16 = vsel %vm247_vm14, %v249_v12, %v245_v15 }
 0x1c9   :  { %v251_v17 = vmul.f32 %v250_v16, %v226_v13 }
 0x1cb   :  { %v382_v58 = vclamps-f32 %v251_v17, 1.0 }
 0x1cd   :  { %v255_v21 = vadd.f32 1.0, %v382_v58 }
 0x1cf   :  { %v257_v23 = vmul.f32 %v255_v21, %v171_v20 }
 0x1d1   :  { %v258_v24 = vpack.c.bf16 %v257_v23, %v256_v22 }
 0x1d3   :  { %335 = vmatmul.bf16.vlgmr.msra.gmra.mxu1 %v258_v24 }
 0x250   :  { %v336_v25 = vpop.f32.mrf.mxu1 }
 0x251   :  { %v337_v26 = vadd.f32 %v435_v7, %v336_v25 }
 0x253   :  { %v341_v27 = vadd.f32 %v337_v26, %v490_v0 }
 0x255   :  { %343 = vst [vmem:[%s594_s7] sm:$0xff] %v341_v27 }
 0x258   :  { %v338_v57 = vpop.f32.mrf.mxu1 }
 0x259   :  { %v339_v28 = vadd.f32 %v435_v7, %v338_v57 }
 0x25b   :  { %v342_v3 = vadd.f32 %v339_v28, %v496_v1 }
 0x25d   :  { %344 = vst [vmem:[%s594_s7 + $0x8] sm:$0xff] %v342_v3 }

</bundles_post_ra>
